<compile_context>
chip_gen: v7x
topology: tpu7x:2x2x1
jax: 0.10.0
libtpu: 0.0.40
codegen_flags: <defaults>
</compile_context>

<pallas_src>
import jax
import jax.numpy as jnp
from jax.experimental import pallas as pl
from jax.experimental.pallas import tpu as pltpu
import numpy as np

LANES = 128


def graphsage_kernel(x_ref, adjr1_ref, adjr2_ref,
                     wps1_ref, bps1_ref, wn1_ref, b1_ref,
                     wps2_ref, bps2_ref, wn2_ref, b2_ref,
                     wo_ref, bo_ref,
                     out_ref):
    """Whole-graph GraphSAGE forward, fully resident in VMEM (small-graph regime)."""
    N = x_ref.shape[0]

    def pool_max(hp, adjr_ref, f_in):
        """neigh128[i, f] = max_j adj[i, j] * hp[j, f] for f < f_in (lanes >= f_in hold partial
        maxes of other lane groups and are nullified by the zero rows of the padded fc_neigh).

        Lane-packed: G = 128 // f_in source nodes per VPU step; adjacency columns are
        pre-replicated into matching lane groups by the wrapper. Valid because hp >= 0
        (post-ReLU) and adj is binary; 0-init matches DGL's zero-fill for isolated nodes.
        """
        G = LANES // f_in
        n_steps = N // G

        # Pack: lane group g of row s holds hp[g*n_steps + s, :]  (lane-concat of sublane slices).
        hp_packed = jnp.concatenate(
            [hp[g * n_steps:(g + 1) * n_steps, :] for g in range(G)], axis=1)   # [n_steps, 128]

        acc = jnp.zeros((N, LANES), jnp.float32)
        for s in range(n_steps):                      # fully unrolled; every step uses all 128 lanes
            adj_slab = adjr_ref[:, s * LANES:(s + 1) * LANES]                   # [N, 128] static slice
            acc = jnp.maximum(acc, adj_slab * hp_packed[s:s + 1, :])

        # Tree-max the G lane groups into lanes [0, f_in): log2(G) XLU rolls + VPU max.
        shift = LANES // 2
        while shift >= f_in:
            acc = jnp.maximum(acc, pltpu.roll(acc, shift=shift, axis=1))
            shift //= 2
        return acc                                                              # [N, 128]

    def sage_layer(h, adjr_ref, wps, bps, wn_pad, b):
        f_in = wps.shape[0]
        # Fused [fc_pool | 0-pad | fc_self] matmul: one MXU pass, split at the 128-lane boundary.
        hs = jnp.dot(h, wps, preferred_element_type=jnp.float32) + bps          # [N, 128 + H]
        hp = jnp.maximum(hs[:, :f_in], 0.0)                                     # ReLU(fc_pool) >= 0
        self_t = hs[:, LANES:]                                                  # h @ fc_self (tile-aligned)
        neigh128 = pool_max(hp, adjr_ref, f_in)                                 # [N, 128]
        # wn_pad has zero rows beyond f_in, so garbage lanes of neigh128 contribute exactly 0.
        rst = self_t + jnp.dot(neigh128, wn_pad, preferred_element_type=jnp.float32) + b
        return jnp.maximum(rst, 0.0)                                            # ReLU activation

    h = x_ref[...]
    h = sage_layer(h, adjr1_ref, wps1_ref[...], bps1_ref[...], wn1_ref[...], b1_ref[...])
    h = sage_layer(h, adjr2_ref, wps2_ref[...], bps2_ref[...], wn2_ref[...], b2_ref[...])
    # output_linear (no activation); classifier pre-padded to a full 128-lane width -> full-lane vst.
    out_ref[...] = jnp.dot(h, wo_ref[...], preferred_element_type=jnp.float32) + bo_ref[...]


def graphsage_forward(adj, x, params):
    N, F_in = x.shape
    H = params["ws1"].shape[1]
    C = params["wo"].shape[1]

    assert LANES % F_in == 0 and LANES % H == 0, "feature widths must divide 128"
    assert N % (LANES // F_in) == 0 and N % (LANES // H) == 0, "N must divide evenly into lane groups"
    # NOTE: adjacency must be binary {0,1} (see correctness guard in the header comment).

    def rep_adj(f):
        """adj_rep[:, s*128 + g*f + k] = adj[:, g*n_steps + s]  (lane-group replication, layout only)."""
        G = LANES // f
        n_steps = N // G
        adj_perm = adj.reshape(N, G, n_steps).transpose(0, 2, 1).reshape(N, N)
        return jnp.repeat(adj_perm, f, axis=1)                                   # [N, N*f]

    adjr1 = rep_adj(F_in)       # 256 KiB at N=64
    adjr2 = rep_adj(H)          # 512 KiB at N=64

    def fuse_pool_self(wp, bp, ws, f):
        """wps = [W_pool | zero-pad to lane 128 | W_self]; fc_self is bias-free."""
        pad = LANES - f
        wps = jnp.concatenate([wp, jnp.zeros((f, pad), jnp.float32), ws], axis=1)      # [f, 128+H]
        bps = jnp.concatenate([bp, jnp.zeros((1, pad + ws.shape[1]), jnp.float32)], axis=1)
        return wps, bps

    wps1, bps1 = fuse_pool_self(params["wp1"], params["bp1"], params["ws1"], F_in)
    wps2, bps2 = fuse_pool_self(params["wp2"], params["bp2"], params["ws2"], H)

    def pad_rows(w, f):
        return jnp.zeros((LANES, w.shape[1]), jnp.float32).at[:f, :].set(w)

    wn1p = pad_rows(params["wn1"], F_in)                                         # [128, H]
    wn2p = pad_rows(params["wn2"], H)                                            # [128, H]

    # Lane-dense output: pad classifier to a multiple of 128 lanes, slice back after the call.
    C_pad = pl.cdiv(C, LANES) * LANES
    wo_p = jnp.zeros((H, C_pad), jnp.float32).at[:, :C].set(params["wo"])
    bo_p = jnp.zeros((1, C_pad), jnp.float32).at[:, :C].set(params["bo"])

    args = (x, adjr1, adjr2,
            wps1, bps1, wn1p, params["b1"],
            wps2, bps2, wn2p, params["b2"],
            wo_p, bo_p)

    out = pl.pallas_call(
        graphsage_kernel,
        out_shape=jax.ShapeDtypeStruct((N, C_pad), jnp.float32),
        # Small graph: whole arrays resident in VMEM, single kernel invocation (no grid).
        in_specs=[pl.BlockSpec(memory_space=pltpu.MemorySpace.VMEM)] * len(args),
        out_specs=pl.BlockSpec(memory_space=pltpu.MemorySpace.VMEM),
        compiler_params=pltpu.CompilerParams(vmem_limit_bytes=4 * 1024 * 1024),
    )(*args)
    return out[:, :C]


def graphsage_reference(adj, x, params):
    """Pure-JAX reference with the original (unfused, -inf-masked) DGL 'pool' semantics."""
    has_neigh = jnp.sum(adj, axis=1, keepdims=True) > 0.0

    def sage_layer(h, wp, bp, ws, wn, b):
        hp = jnp.maximum(h @ wp + bp, 0.0)
        msgs = jnp.where(adj[:, :, None] > 0.0, hp[None, :, :], -jnp.inf)
        neigh = jnp.where(has_neigh, jnp.max(msgs, axis=1), 0.0)
        return jnp.maximum(h @ ws + neigh @ wn + b, 0.0)

    h = sage_layer(x, params["wp1"], params["bp1"], params["ws1"], params["wn1"], params["b1"])
    h = sage_layer(h, params["wp2"], params["bp2"], params["ws2"], params["wn2"], params["b2"])
    return h @ params["wo"] + params["bo"]


def init_params(key, in_feats, h_feats, num_classes):
    ks = jax.random.split(key, 16)

    def w(k, shape, fan_in):
        return (jax.random.normal(k, shape, jnp.float32) / np.sqrt(fan_in)).astype(jnp.float32)

    return {
        # Layer 1: SAGEConv(in_feats -> h_feats, 'pool')
        "wp1": w(ks[0], (in_feats, in_feats), in_feats),      # fc_pool weight (in -> in)
        "bp1": w(ks[1], (1, in_feats), in_feats),             # fc_pool bias
        "ws1": w(ks[2], (in_feats, h_feats), in_feats),       # fc_self (bias=False)
        "wn1": w(ks[3], (in_feats, h_feats), in_feats),       # fc_neigh (bias=False)
        "b1":  w(ks[4], (1, h_feats), h_feats),               # SAGEConv bias
        # Layer 2: SAGEConv(h_feats -> h_feats, 'pool')
        "wp2": w(ks[5], (h_feats, h_feats), h_feats),
        "bp2": w(ks[6], (1, h_feats), h_feats),
        "ws2": w(ks[7], (h_feats, h_feats), h_feats),
        "wn2": w(ks[8], (h_feats, h_feats), h_feats),
        "b2":  w(ks[9], (1, h_feats), h_feats),
        # output_linear: Linear(h_feats, num_classes)
        "wo":  w(ks[10], (h_feats, num_classes), h_feats),
        "bo":  w(ks[11], (1, num_classes), h_feats),
    }


if __name__ == "__main__":
    N, IN_FEATS, H_FEATS, NUM_CLASSES = 64, 16, 32, 2

    key = jax.random.PRNGKey(0)
    k_feat, k_adj, k_params = jax.random.split(key, 3)

    # Deterministic node features and random directed graph (self-loops guarantee in-degree >= 1).
    x = jax.random.normal(k_feat, (N, IN_FEATS), jnp.float32)
    adj = (jax.random.uniform(k_adj, (N, N)) < 0.15).astype(jnp.float32)
    adj = jnp.maximum(adj, jnp.eye(N, dtype=jnp.float32))     # adj[i, j] = 1 iff edge j -> i

    # Guard: the kernel's 0-init running max requires a strictly binary adjacency.
    adj_np = np.asarray(adj)
    assert np.all((adj_np == 0.0) | (adj_np == 1.0)), "adjacency must be binary for the pool kernel"

    params = init_params(k_params, IN_FEATS, H_FEATS, NUM_CLASSES)

    out = graphsage_forward(adj, x, params)
    out = jax.block_until_ready(out)

    ref = jax.block_until_ready(graphsage_reference(adj, x, params))
    np.testing.assert_allclose(np.asarray(out), np.asarray(ref), rtol=1e-5, atol=1e-5)

    assert out.shape == (N, NUM_CLASSES) and out.dtype == jnp.float32
    print("KERNEL_OK")
</pallas_src>

<mosaic_0001>
module attributes {stable_mosaic.version = 11 : i64} {
  func.func @graphsage_kernel(%arg0: memref<64x16xf32, #tpu.memory_space<vmem>>, %arg1: memref<64x1024xf32, #tpu.memory_space<vmem>>, %arg2: memref<64x2048xf32, #tpu.memory_space<vmem>>, %arg3: memref<16x160xf32, #tpu.memory_space<vmem>>, %arg4: memref<1x160xf32, #tpu.memory_space<vmem>>, %arg5: memref<128x32xf32, #tpu.memory_space<vmem>>, %arg6: memref<1x32xf32, #tpu.memory_space<vmem>>, %arg7: memref<32x160xf32, #tpu.memory_space<vmem>>, %arg8: memref<1x160xf32, #tpu.memory_space<vmem>>, %arg9: memref<128x32xf32, #tpu.memory_space<vmem>>, %arg10: memref<1x32xf32, #tpu.memory_space<vmem>>, %arg11: memref<32x128xf32, #tpu.memory_space<vmem>>, %arg12: memref<1x128xf32, #tpu.memory_space<vmem>>, %arg13: memref<64x128xf32, #tpu.memory_space<vmem>>) attributes {dimension_semantics = [], scalar_prefetch = 0 : i64, scratch_operands = 0 : i64, tpu.core_type = #tpu.core_type<tc>} {
    %c0 = arith.constant 0 : index
    %c0_0 = arith.constant 0 : index
    %0 = vector.load %arg0[%c0, %c0_0] : memref<64x16xf32, #tpu.memory_space<vmem>>, vector<64x16xf32>
    %c0_1 = arith.constant 0 : index
    %c0_2 = arith.constant 0 : index
    %1 = vector.load %arg3[%c0_1, %c0_2] : memref<16x160xf32, #tpu.memory_space<vmem>>, vector<16x160xf32>
    %c0_3 = arith.constant 0 : index
    %c0_4 = arith.constant 0 : index
    %2 = vector.load %arg4[%c0_3, %c0_4] : memref<1x160xf32, #tpu.memory_space<vmem>>, vector<1x160xf32>
    %c0_5 = arith.constant 0 : index
    %c0_6 = arith.constant 0 : index
    %3 = vector.load %arg5[%c0_5, %c0_6] : memref<128x32xf32, #tpu.memory_space<vmem>>, vector<128x32xf32>
    %c0_7 = arith.constant 0 : index
    %c0_8 = arith.constant 0 : index
    %4 = vector.load %arg6[%c0_7, %c0_8] : memref<1x32xf32, #tpu.memory_space<vmem>>, vector<1x32xf32>
    %cst = arith.constant dense<0.000000e+00> : vector<64x160xf32>
    %5 = tpu.matmul %0, %1, %cst {dimension_numbers = #tpu.dot_dimension_numbers<[1], [0], [0], [1], [0, 0, 1, 1], [], []>} : vector<64x16xf32>, vector<16x160xf32>, vector<64x160xf32> -> vector<64x160xf32>
    %6 = vector.broadcast %2 : vector<1x160xf32> to vector<64x160xf32>
    %7 = arith.addf %5, %6 : vector<64x160xf32>
    %8 = vector.extract_strided_slice %7 {offsets = [0, 0], sizes = [64, 16], strides = [1, 1]} : vector<64x160xf32> to vector<64x16xf32>
    %cst_9 = arith.constant 0.000000e+00 : f32
    %9 = vector.broadcast %cst_9 : f32 to vector<64x16xf32>
    %10 = arith.maximumf %8, %9 : vector<64x16xf32>
    %11 = vector.extract_strided_slice %7 {offsets = [0, 128], sizes = [64, 32], strides = [1, 1]} : vector<64x160xf32> to vector<64x32xf32>
    %12 = vector.extract_strided_slice %10 {offsets = [0, 0], sizes = [8, 16], strides = [1, 1]} : vector<64x16xf32> to vector<8x16xf32>
    %13 = vector.extract_strided_slice %10 {offsets = [8, 0], sizes = [8, 16], strides = [1, 1]} : vector<64x16xf32> to vector<8x16xf32>
    %14 = vector.extract_strided_slice %10 {offsets = [16, 0], sizes = [8, 16], strides = [1, 1]} : vector<64x16xf32> to vector<8x16xf32>
    %15 = vector.extract_strided_slice %10 {offsets = [24, 0], sizes = [8, 16], strides = [1, 1]} : vector<64x16xf32> to vector<8x16xf32>
    %16 = vector.extract_strided_slice %10 {offsets = [32, 0], sizes = [8, 16], strides = [1, 1]} : vector<64x16xf32> to vector<8x16xf32>
    %17 = vector.extract_strided_slice %10 {offsets = [40, 0], sizes = [8, 16], strides = [1, 1]} : vector<64x16xf32> to vector<8x16xf32>
    %18 = vector.extract_strided_slice %10 {offsets = [48, 0], sizes = [8, 16], strides = [1, 1]} : vector<64x16xf32> to vector<8x16xf32>
    %19 = vector.extract_strided_slice %10 {offsets = [56, 0], sizes = [8, 16], strides = [1, 1]} : vector<64x16xf32> to vector<8x16xf32>
    %20 = tpu.concatenate %12, %13, %14, %15, %16, %17, %18, %19 in 1 : vector<8x16xf32>, vector<8x16xf32>, vector<8x16xf32>, vector<8x16xf32>, vector<8x16xf32>, vector<8x16xf32>, vector<8x16xf32>, vector<8x16xf32> -> vector<8x128xf32>
    %cst_10 = arith.constant 0.000000e+00 : f32
    %21 = vector.broadcast %cst_10 : f32 to vector<64x128xf32>
    %c0_11 = arith.constant 0 : index
    %c0_12 = arith.constant 0 : index
    %22 = vector.load %arg1[%c0_11, %c0_12] : memref<64x1024xf32, #tpu.memory_space<vmem>>, vector<64x128xf32>
    %23 = vector.extract_strided_slice %20 {offsets = [0, 0], sizes = [1, 128], strides = [1, 1]} : vector<8x128xf32> to vector<1x128xf32>
    %24 = vector.broadcast %23 : vector<1x128xf32> to vector<64x128xf32>
    %25 = arith.mulf %22, %24 : vector<64x128xf32>
    %26 = arith.maximumf %21, %25 : vector<64x128xf32>
    %c0_13 = arith.constant 0 : index
    %c128 = arith.constant 128 : index
    %27 = vector.load %arg1[%c0_13, %c128] : memref<64x1024xf32, #tpu.memory_space<vmem>>, vector<64x128xf32>
    %28 = vector.extract_strided_slice %20 {offsets = [1, 0], sizes = [1, 128], strides = [1, 1]} : vector<8x128xf32> to vector<1x128xf32>
    %29 = vector.broadcast %28 : vector<1x128xf32> to vector<64x128xf32>
    %30 = arith.mulf %27, %29 : vector<64x128xf32>
    %31 = arith.maximumf %26, %30 : vector<64x128xf32>
    %c0_14 = arith.constant 0 : index
    %c256 = arith.constant 256 : index
    %32 = vector.load %arg1[%c0_14, %c256] : memref<64x1024xf32, #tpu.memory_space<vmem>>, vector<64x128xf32>
    %33 = vector.extract_strided_slice %20 {offsets = [2, 0], sizes = [1, 128], strides = [1, 1]} : vector<8x128xf32> to vector<1x128xf32>
    %34 = vector.broadcast %33 : vector<1x128xf32> to vector<64x128xf32>
    %35 = arith.mulf %32, %34 : vector<64x128xf32>
    %36 = arith.maximumf %31, %35 : vector<64x128xf32>
    %c0_15 = arith.constant 0 : index
    %c384 = arith.constant 384 : index
    %37 = vector.load %arg1[%c0_15, %c384] : memref<64x1024xf32, #tpu.memory_space<vmem>>, vector<64x128xf32>
    %38 = vector.extract_strided_slice %20 {offsets = [3, 0], sizes = [1, 128], strides = [1, 1]} : vector<8x128xf32> to vector<1x128xf32>
    %39 = vector.broadcast %38 : vector<1x128xf32> to vector<64x128xf32>
    %40 = arith.mulf %37, %39 : vector<64x128xf32>
    %41 = arith.maximumf %36, %40 : vector<64x128xf32>
    %c0_16 = arith.constant 0 : index
    %c512 = arith.constant 512 : index
    %42 = vector.load %arg1[%c0_16, %c512] : memref<64x1024xf32, #tpu.memory_space<vmem>>, vector<64x128xf32>
    %43 = vector.extract_strided_slice %20 {offsets = [4, 0], sizes = [1, 128], strides = [1, 1]} : vector<8x128xf32> to vector<1x128xf32>
    %44 = vector.broadcast %43 : vector<1x128xf32> to vector<64x128xf32>
    %45 = arith.mulf %42, %44 : vector<64x128xf32>
    %46 = arith.maximumf %41, %45 : vector<64x128xf32>
    %c0_17 = arith.constant 0 : index
    %c640 = arith.constant 640 : index
    %47 = vector.load %arg1[%c0_17, %c640] : memref<64x1024xf32, #tpu.memory_space<vmem>>, vector<64x128xf32>
    %48 = vector.extract_strided_slice %20 {offsets = [5, 0], sizes = [1, 128], strides = [1, 1]} : vector<8x128xf32> to vector<1x128xf32>
    %49 = vector.broadcast %48 : vector<1x128xf32> to vector<64x128xf32>
    %50 = arith.mulf %47, %49 : vector<64x128xf32>
    %51 = arith.maximumf %46, %50 : vector<64x128xf32>
    %c0_18 = arith.constant 0 : index
    %c768 = arith.constant 768 : index
    %52 = vector.load %arg1[%c0_18, %c768] : memref<64x1024xf32, #tpu.memory_space<vmem>>, vector<64x128xf32>
    %53 = vector.extract_strided_slice %20 {offsets = [6, 0], sizes = [1, 128], strides = [1, 1]} : vector<8x128xf32> to vector<1x128xf32>
    %54 = vector.broadcast %53 : vector<1x128xf32> to vector<64x128xf32>
    %55 = arith.mulf %52, %54 : vector<64x128xf32>
    %56 = arith.maximumf %51, %55 : vector<64x128xf32>
    %c0_19 = arith.constant 0 : index
    %c896 = arith.constant 896 : index
    %57 = vector.load %arg1[%c0_19, %c896] : memref<64x1024xf32, #tpu.memory_space<vmem>>, vector<64x128xf32>
    %58 = vector.extract_strided_slice %20 {offsets = [7, 0], sizes = [1, 128], strides = [1, 1]} : vector<8x128xf32> to vector<1x128xf32>
    %59 = vector.broadcast %58 : vector<1x128xf32> to vector<64x128xf32>
    %60 = arith.mulf %57, %59 : vector<64x128xf32>
    %61 = arith.maximumf %56, %60 : vector<64x128xf32>
    %c64_i32 = arith.constant 64 : i32
    %62 = tpu.dynamic_rotate %61 by %c64_i32 dim 1 : vector<64x128xf32>, i32 -> vector<64x128xf32>
    %63 = arith.maximumf %61, %62 : vector<64x128xf32>
    %c32_i32 = arith.constant 32 : i32
    %64 = tpu.dynamic_rotate %63 by %c32_i32 dim 1 : vector<64x128xf32>, i32 -> vector<64x128xf32>
    %65 = arith.maximumf %63, %64 : vector<64x128xf32>
    %c16_i32 = arith.constant 16 : i32
    %66 = tpu.dynamic_rotate %65 by %c16_i32 dim 1 : vector<64x128xf32>, i32 -> vector<64x128xf32>
    %67 = arith.maximumf %65, %66 : vector<64x128xf32>
    %cst_20 = arith.constant dense<0.000000e+00> : vector<64x32xf32>
    %68 = tpu.matmul %67, %3, %cst_20 {dimension_numbers = #tpu.dot_dimension_numbers<[1], [0], [0], [1], [0, 0, 1, 1], [], []>} : vector<64x128xf32>, vector<128x32xf32>, vector<64x32xf32> -> vector<64x32xf32>
    %69 = arith.addf %11, %68 : vector<64x32xf32>
    %70 = vector.broadcast %4 : vector<1x32xf32> to vector<64x32xf32>
    %71 = arith.addf %69, %70 : vector<64x32xf32>
    %cst_21 = arith.constant 0.000000e+00 : f32
    %72 = vector.broadcast %cst_21 : f32 to vector<64x32xf32>
    %73 = arith.maximumf %71, %72 : vector<64x32xf32>
    %c0_22 = arith.constant 0 : index
    %c0_23 = arith.constant 0 : index
    %74 = vector.load %arg7[%c0_22, %c0_23] : memref<32x160xf32, #tpu.memory_space<vmem>>, vector<32x160xf32>
    %c0_24 = arith.constant 0 : index
    %c0_25 = arith.constant 0 : index
    %75 = vector.load %arg8[%c0_24, %c0_25] : memref<1x160xf32, #tpu.memory_space<vmem>>, vector<1x160xf32>
    %c0_26 = arith.constant 0 : index
    %c0_27 = arith.constant 0 : index
    %76 = vector.load %arg9[%c0_26, %c0_27] : memref<128x32xf32, #tpu.memory_space<vmem>>, vector<128x32xf32>
    %c0_28 = arith.constant 0 : index
    %c0_29 = arith.constant 0 : index
    %77 = vector.load %arg10[%c0_28, %c0_29] : memref<1x32xf32, #tpu.memory_space<vmem>>, vector<1x32xf32>
    %cst_30 = arith.constant dense<0.000000e+00> : vector<64x160xf32>
    %78 = tpu.matmul %73, %74, %cst_30 {dimension_numbers = #tpu.dot_dimension_numbers<[1], [0], [0], [1], [0, 0, 1, 1], [], []>} : vector<64x32xf32>, vector<32x160xf32>, vector<64x160xf32> -> vector<64x160xf32>
    %79 = vector.broadcast %75 : vector<1x160xf32> to vector<64x160xf32>
    %80 = arith.addf %78, %79 : vector<64x160xf32>
    %81 = vector.extract_strided_slice %80 {offsets = [0, 0], sizes = [64, 32], strides = [1, 1]} : vector<64x160xf32> to vector<64x32xf32>
    %cst_31 = arith.constant 0.000000e+00 : f32
    %82 = vector.broadcast %cst_31 : f32 to vector<64x32xf32>
    %83 = arith.maximumf %81, %82 : vector<64x32xf32>
    %84 = vector.extract_strided_slice %80 {offsets = [0, 128], sizes = [64, 32], strides = [1, 1]} : vector<64x160xf32> to vector<64x32xf32>
    %85 = vector.extract_strided_slice %83 {offsets = [0, 0], sizes = [16, 32], strides = [1, 1]} : vector<64x32xf32> to vector<16x32xf32>
    %86 = vector.extract_strided_slice %83 {offsets = [16, 0], sizes = [16, 32], strides = [1, 1]} : vector<64x32xf32> to vector<16x32xf32>
    %87 = vector.extract_strided_slice %83 {offsets = [32, 0], sizes = [16, 32], strides = [1, 1]} : vector<64x32xf32> to vector<16x32xf32>
    %88 = vector.extract_strided_slice %83 {offsets = [48, 0], sizes = [16, 32], strides = [1, 1]} : vector<64x32xf32> to vector<16x32xf32>
    %89 = tpu.concatenate %85, %86, %87, %88 in 1 : vector<16x32xf32>, vector<16x32xf32>, vector<16x32xf32>, vector<16x32xf32> -> vector<16x128xf32>
    %cst_32 = arith.constant 0.000000e+00 : f32
    %90 = vector.broadcast %cst_32 : f32 to vector<64x128xf32>
    %c0_33 = arith.constant 0 : index
    %c0_34 = arith.constant 0 : index
    %91 = vector.load %arg2[%c0_33, %c0_34] : memref<64x2048xf32, #tpu.memory_space<vmem>>, vector<64x128xf32>
    %92 = vector.extract_strided_slice %89 {offsets = [0, 0], sizes = [1, 128], strides = [1, 1]} : vector<16x128xf32> to vector<1x128xf32>
    %93 = vector.broadcast %92 : vector<1x128xf32> to vector<64x128xf32>
    %94 = arith.mulf %91, %93 : vector<64x128xf32>
    %95 = arith.maximumf %90, %94 : vector<64x128xf32>
    %c0_35 = arith.constant 0 : index
    %c128_36 = arith.constant 128 : index
    %96 = vector.load %arg2[%c0_35, %c128_36] : memref<64x2048xf32, #tpu.memory_space<vmem>>, vector<64x128xf32>
    %97 = vector.extract_strided_slice %89 {offsets = [1, 0], sizes = [1, 128], strides = [1, 1]} : vector<16x128xf32> to vector<1x128xf32>
    %98 = vector.broadcast %97 : vector<1x128xf32> to vector<64x128xf32>
    %99 = arith.mulf %96, %98 : vector<64x128xf32>
    %100 = arith.maximumf %95, %99 : vector<64x128xf32>
    %c0_37 = arith.constant 0 : index
    %c256_38 = arith.constant 256 : index
    %101 = vector.load %arg2[%c0_37, %c256_38] : memref<64x2048xf32, #tpu.memory_space<vmem>>, vector<64x128xf32>
    %102 = vector.extract_strided_slice %89 {offsets = [2, 0], sizes = [1, 128], strides = [1, 1]} : vector<16x128xf32> to vector<1x128xf32>
    %103 = vector.broadcast %102 : vector<1x128xf32> to vector<64x128xf32>
    %104 = arith.mulf %101, %103 : vector<64x128xf32>
    %105 = arith.maximumf %100, %104 : vector<64x128xf32>
    %c0_39 = arith.constant 0 : index
    %c384_40 = arith.constant 384 : index
    %106 = vector.load %arg2[%c0_39, %c384_40] : memref<64x2048xf32, #tpu.memory_space<vmem>>, vector<64x128xf32>
    %107 = vector.extract_strided_slice %89 {offsets = [3, 0], sizes = [1, 128], strides = [1, 1]} : vector<16x128xf32> to vector<1x128xf32>
    %108 = vector.broadcast %107 : vector<1x128xf32> to vector<64x128xf32>
    %109 = arith.mulf %106, %108 : vector<64x128xf32>
    %110 = arith.maximumf %105, %109 : vector<64x128xf32>
    %c0_41 = arith.constant 0 : index
    %c512_42 = arith.constant 512 : index
    %111 = vector.load %arg2[%c0_41, %c512_42] : memref<64x2048xf32, #tpu.memory_space<vmem>>, vector<64x128xf32>
    %112 = vector.extract_strided_slice %89 {offsets = [4, 0], sizes = [1, 128], strides = [1, 1]} : vector<16x128xf32> to vector<1x128xf32>
    %113 = vector.broadcast %112 : vector<1x128xf32> to vector<64x128xf32>
    %114 = arith.mulf %111, %113 : vector<64x128xf32>
    %115 = arith.maximumf %110, %114 : vector<64x128xf32>
    %c0_43 = arith.constant 0 : index
    %c640_44 = arith.constant 640 : index
    %116 = vector.load %arg2[%c0_43, %c640_44] : memref<64x2048xf32, #tpu.memory_space<vmem>>, vector<64x128xf32>
    %117 = vector.extract_strided_slice %89 {offsets = [5, 0], sizes = [1, 128], strides = [1, 1]} : vector<16x128xf32> to vector<1x128xf32>
    %118 = vector.broadcast %117 : vector<1x128xf32> to vector<64x128xf32>
    %119 = arith.mulf %116, %118 : vector<64x128xf32>
    %120 = arith.maximumf %115, %119 : vector<64x128xf32>
    %c0_45 = arith.constant 0 : index
    %c768_46 = arith.constant 768 : index
    %121 = vector.load %arg2[%c0_45, %c768_46] : memref<64x2048xf32, #tpu.memory_space<vmem>>, vector<64x128xf32>
    %122 = vector.extract_strided_slice %89 {offsets = [6, 0], sizes = [1, 128], strides = [1, 1]} : vector<16x128xf32> to vector<1x128xf32>
    %123 = vector.broadcast %122 : vector<1x128xf32> to vector<64x128xf32>
    %124 = arith.mulf %121, %123 : vector<64x128xf32>
    %125 = arith.maximumf %120, %124 : vector<64x128xf32>
    %c0_47 = arith.constant 0 : index
    %c896_48 = arith.constant 896 : index
    %126 = vector.load %arg2[%c0_47, %c896_48] : memref<64x2048xf32, #tpu.memory_space<vmem>>, vector<64x128xf32>
    %127 = vector.extract_strided_slice %89 {offsets = [7, 0], sizes = [1, 128], strides = [1, 1]} : vector<16x128xf32> to vector<1x128xf32>
    %128 = vector.broadcast %127 : vector<1x128xf32> to vector<64x128xf32>
    %129 = arith.mulf %126, %128 : vector<64x128xf32>
    %130 = arith.maximumf %125, %129 : vector<64x128xf32>
    %c0_49 = arith.constant 0 : index
    %c1024 = arith.constant 1024 : index
    %131 = vector.load %arg2[%c0_49, %c1024] : memref<64x2048xf32, #tpu.memory_space<vmem>>, vector<64x128xf32>
    %132 = vector.extract_strided_slice %89 {offsets = [8, 0], sizes = [1, 128], strides = [1, 1]} : vector<16x128xf32> to vector<1x128xf32>
    %133 = vector.broadcast %132 : vector<1x128xf32> to vector<64x128xf32>
    %134 = arith.mulf %131, %133 : vector<64x128xf32>
    %135 = arith.maximumf %130, %134 : vector<64x128xf32>
    %c0_50 = arith.constant 0 : index
    %c1152 = arith.constant 1152 : index
    %136 = vector.load %arg2[%c0_50, %c1152] : memref<64x2048xf32, #tpu.memory_space<vmem>>, vector<64x128xf32>
    %137 = vector.extract_strided_slice %89 {offsets = [9, 0], sizes = [1, 128], strides = [1, 1]} : vector<16x128xf32> to vector<1x128xf32>
    %138 = vector.broadcast %137 : vector<1x128xf32> to vector<64x128xf32>
    %139 = arith.mulf %136, %138 : vector<64x128xf32>
    %140 = arith.maximumf %135, %139 : vector<64x128xf32>
    %c0_51 = arith.constant 0 : index
    %c1280 = arith.constant 1280 : index
    %141 = vector.load %arg2[%c0_51, %c1280] : memref<64x2048xf32, #tpu.memory_space<vmem>>, vector<64x128xf32>
    %142 = vector.extract_strided_slice %89 {offsets = [10, 0], sizes = [1, 128], strides = [1, 1]} : vector<16x128xf32> to vector<1x128xf32>
    %143 = vector.broadcast %142 : vector<1x128xf32> to vector<64x128xf32>
    %144 = arith.mulf %141, %143 : vector<64x128xf32>
    %145 = arith.maximumf %140, %144 : vector<64x128xf32>
    %c0_52 = arith.constant 0 : index
    %c1408 = arith.constant 1408 : index
    %146 = vector.load %arg2[%c0_52, %c1408] : memref<64x2048xf32, #tpu.memory_space<vmem>>, vector<64x128xf32>
    %147 = vector.extract_strided_slice %89 {offsets = [11, 0], sizes = [1, 128], strides = [1, 1]} : vector<16x128xf32> to vector<1x128xf32>
    %148 = vector.broadcast %147 : vector<1x128xf32> to vector<64x128xf32>
    %149 = arith.mulf %146, %148 : vector<64x128xf32>
    %150 = arith.maximumf %145, %149 : vector<64x128xf32>
    %c0_53 = arith.constant 0 : index
    %c1536 = arith.constant 1536 : index
    %151 = vector.load %arg2[%c0_53, %c1536] : memref<64x2048xf32, #tpu.memory_space<vmem>>, vector<64x128xf32>
    %152 = vector.extract_strided_slice %89 {offsets = [12, 0], sizes = [1, 128], strides = [1, 1]} : vector<16x128xf32> to vector<1x128xf32>
    %153 = vector.broadcast %152 : vector<1x128xf32> to vector<64x128xf32>
    %154 = arith.mulf %151, %153 : vector<64x128xf32>
    %155 = arith.maximumf %150, %154 : vector<64x128xf32>
    %c0_54 = arith.constant 0 : index
    %c1664 = arith.constant 1664 : index
    %156 = vector.load %arg2[%c0_54, %c1664] : memref<64x2048xf32, #tpu.memory_space<vmem>>, vector<64x128xf32>
    %157 = vector.extract_strided_slice %89 {offsets = [13, 0], sizes = [1, 128], strides = [1, 1]} : vector<16x128xf32> to vector<1x128xf32>
    %158 = vector.broadcast %157 : vector<1x128xf32> to vector<64x128xf32>
    %159 = arith.mulf %156, %158 : vector<64x128xf32>
    %160 = arith.maximumf %155, %159 : vector<64x128xf32>
    %c0_55 = arith.constant 0 : index
    %c1792 = arith.constant 1792 : index
    %161 = vector.load %arg2[%c0_55, %c1792] : memref<64x2048xf32, #tpu.memory_space<vmem>>, vector<64x128xf32>
    %162 = vector.extract_strided_slice %89 {offsets = [14, 0], sizes = [1, 128], strides = [1, 1]} : vector<16x128xf32> to vector<1x128xf32>
    %163 = vector.broadcast %162 : vector<1x128xf32> to vector<64x128xf32>
    %164 = arith.mulf %161, %163 : vector<64x128xf32>
    %165 = arith.maximumf %160, %164 : vector<64x128xf32>
    %c0_56 = arith.constant 0 : index
    %c1920 = arith.constant 1920 : index
    %166 = vector.load %arg2[%c0_56, %c1920] : memref<64x2048xf32, #tpu.memory_space<vmem>>, vector<64x128xf32>
    %167 = vector.extract_strided_slice %89 {offsets = [15, 0], sizes = [1, 128], strides = [1, 1]} : vector<16x128xf32> to vector<1x128xf32>
    %168 = vector.broadcast %167 : vector<1x128xf32> to vector<64x128xf32>
    %169 = arith.mulf %166, %168 : vector<64x128xf32>
    %170 = arith.maximumf %165, %169 : vector<64x128xf32>
    %c64_i32_57 = arith.constant 64 : i32
    %171 = tpu.dynamic_rotate %170 by %c64_i32_57 dim 1 : vector<64x128xf32>, i32 -> vector<64x128xf32>
    %172 = arith.maximumf %170, %171 : vector<64x128xf32>
    %c32_i32_58 = arith.constant 32 : i32
    %173 = tpu.dynamic_rotate %172 by %c32_i32_58 dim 1 : vector<64x128xf32>, i32 -> vector<64x128xf32>
    %174 = arith.maximumf %172, %173 : vector<64x128xf32>
    %cst_59 = arith.constant dense<0.000000e+00> : vector<64x32xf32>
    %175 = tpu.matmul %174, %76, %cst_59 {dimension_numbers = #tpu.dot_dimension_numbers<[1], [0], [0], [1], [0, 0, 1, 1], [], []>} : vector<64x128xf32>, vector<128x32xf32>, vector<64x32xf32> -> vector<64x32xf32>
    %176 = arith.addf %84, %175 : vector<64x32xf32>
    %177 = vector.broadcast %77 : vector<1x32xf32> to vector<64x32xf32>
    %178 = arith.addf %176, %177 : vector<64x32xf32>
    %cst_60 = arith.constant 0.000000e+00 : f32
    %179 = vector.broadcast %cst_60 : f32 to vector<64x32xf32>
    %180 = arith.maximumf %178, %179 : vector<64x32xf32>
    %c0_61 = arith.constant 0 : index
    %c0_62 = arith.constant 0 : index
    %181 = vector.load %arg11[%c0_61, %c0_62] : memref<32x128xf32, #tpu.memory_space<vmem>>, vector<32x128xf32>
    %cst_63 = arith.constant dense<0.000000e+00> : vector<64x128xf32>
    %182 = tpu.matmul %180, %181, %cst_63 {dimension_numbers = #tpu.dot_dimension_numbers<[1], [0], [0], [1], [0, 0, 1, 1], [], []>} : vector<64x32xf32>, vector<32x128xf32>, vector<64x128xf32> -> vector<64x128xf32>
    %c0_64 = arith.constant 0 : index
    %c0_65 = arith.constant 0 : index
    %183 = vector.load %arg12[%c0_64, %c0_65] : memref<1x128xf32, #tpu.memory_space<vmem>>, vector<1x128xf32>
    %184 = vector.broadcast %183 : vector<1x128xf32> to vector<64x128xf32>
    %185 = arith.addf %182, %184 : vector<64x128xf32>
    %c0_66 = arith.constant 0 : index
    %c0_67 = arith.constant 0 : index
    %186 = vector.load %arg13[%c0_66, %c0_67] : memref<64x128xf32, #tpu.memory_space<vmem>>, vector<64x128xf32>
    tpu.vector_store %arg13[%c0_66, %c0_67], %185 {strides = array<i32>} : memref<64x128xf32, #tpu.memory_space<vmem>>, vector<64x128xf32>,
    return
  }
}

</mosaic_0001>

<bundles_post_ra>
// kernel: tpu_custom_call.1
= control target key start
LH: loop header
LB: loop body
LE: loop exit
PB: predicated region body
PF: predicated region fallthrough
CT: control target
= control target key end

     0   :  { %18 = vsyncpa [#allocation3], 0  ;;  %s3051_s0 = inlined_call_operand.vmem [shape: f32[64,16], index: 0, kind: input, shape index: {}]   ;;  %s3052_s1 = inlined_call_operand.hbm [shape: f32[64,1024], index: 1, kind: input, shape index: {}]   ;;  %s3053_s2 = inlined_call_operand.hbm [shape: f32[64,2048], index: 2, kind: input, shape index: {}]   ;;  %s3054_s3 = inlined_call_operand.vmem [shape: f32[16,160], index: 3, kind: input, shape index: {}]   ;;  %s3055_s4 = inlined_call_operand.vmem [shape: f32[1,160], index: 4, kind: input, shape index: {}]   ;;  %s3056_s5 = inlined_call_operand.vmem [shape: f32[128,32], index: 5, kind: input, shape index: {}]   ;;  %s3057_s6 = inlined_call_operand.vmem [shape: f32[1,32], index: 6, kind: input, shape index: {}]   ;;  %s3058_s7 = inlined_call_operand.vmem [shape: f32[32,160], index: 7, kind: input, shape index: {}]   ;;  %s3059_s8 = inlined_call_operand.vmem [shape: f32[1,160], index: 8, kind: input, shape index: {}]   ;;  %s3060_s9 = inlined_call_operand.vmem [shape: f32[128,32], index: 9, kind: input, shape index: {}]   ;;  %s3061_s10 = inlined_call_operand.vmem [shape: f32[1,32], index: 10, kind: input, shape index: {}]   ;;  %s3062_s11 = inlined_call_operand.vmem [shape: f32[32,128], index: 11, kind: input, shape index: {}]   ;;  %s3063_s12 = inlined_call_operand.vmem [shape: f32[1,128], index: 12, kind: input, shape index: {}]   ;;  %s3064_s13 = inlined_call_operand.hbm [shape: f32[64,128], index: 13, kind: output, shape index: {}]  }
   0x1   :  { %19 = vsyncpa [#allocation6], 0 }
   0x2   :  { %20 = vsyncpa [#allocation4], 0  ;;  %s2208_s25 = smov [#allocation2]   ;;  %s2136_s29 = scalar_lea.hbm %s3052_s1, 8192 }
   0x3   :  { %s28_s26 = sshll.u32 %s2208_s25, 4  ;;  %p2137_p0 = scmp.ne.s32.totalorder %s3052_s1, %s2136_s29  ;;  %s29_s26 = int_to_ptr.vmem [resolvable:$true] %s28_s26 }
   0x4   :  { %p2140_p1 = scmp.lt.u32.totalorder %s2136_s29, %s3052_s1 }
   0x6   :  { %p2142_p2 = pnand %p2140_p1, %p2137_p0 }
   0x8   :  { %2145 = shalt.err (!%p2142_p2)
}
   0x9   :  { %s2146_s17 = scalar_lea.vmem %s29_s26, 8192  ;;  %p2151_p4 = scmp.lt.s32.totalorder %s29_s26, %s29_s26 }
   0xa   :  { %p2147_p3 = scmp.ne.s32.totalorder %s29_s26, %s2146_s17  ;;  %p2152_p5 = scmp.lt.s32.totalorder %s2146_s17, %s2146_s17 }
   0xc   :  { %p2153_p6 = por %p2152_p5, %p2151_p4 }
   0xe   :  { %p2154_p7 = pnand %p2153_p6, %p2147_p3 }
  0x10   :  { %2157 = shalt.err (!%p2154_p7)
}
  0x11   :  { %s2209_s18 = smov 1024   ;;  %s2210_s19 = smov 64  }
  0x12   :  { %34 = dma.hbm_to_vmem [thread:$0]  %s3052_s1, 8192, %s29_s26, [#allocation3], %s2209_s18, %s2209_s18, %s2210_s19  }
  0x13   :  { %s2211_s22 = smov [#allocation5]   ;;  %s2158_s27 = scalar_lea.hbm %s3053_s2, 16384 }
  0x14   :  { %s40_s23 = sshll.u32 %s2211_s22, 4  ;;  %p2159_p8 = scmp.ne.s32.totalorder %s3053_s2, %s2158_s27  ;;  %s41_s23 = int_to_ptr.vmem [resolvable:$true] %s40_s23 }
  0x15   :  { %p2162_p9 = scmp.lt.u32.totalorder %s2158_s27, %s3053_s2 }
  0x17   :  { %p2164_p10 = pnand %p2162_p9, %p2159_p8 }
  0x19   :  { %2167 = shalt.err (!%p2164_p10)
}
  0x1a   :  { %s2168_s15 = scalar_lea.vmem %s41_s23, 16384  ;;  %p2173_p12 = scmp.lt.s32.totalorder %s41_s23, %s41_s23 }
  0x1b   :  { %p2169_p11 = scmp.ne.s32.totalorder %s41_s23, %s2168_s15  ;;  %p2174_p13 = scmp.lt.s32.totalorder %s2168_s15, %s2168_s15 }
  0x1d   :  { %p2175_p0 = por %p2174_p13, %p2173_p12 }
  0x1f   :  { %p2176_p1 = pnand %p2175_p0, %p2169_p11 }
  0x21   :  { %2179 = shalt.err (!%p2176_p1)
}
  0x22   :  { %s2212_s1 = smov 2048   ;;  %s2213_s26 = smov 128  }
  0x23   :  { %46 = dma.hbm_to_vmem [thread:$0]  %s3053_s2, 16384, %s41_s23, [#allocation6], %s2212_s1, %s2212_s1, %s2213_s26  }
  0x24   :  { %2202 = dma.done.wait [#allocation3], 8192  }
  0x25   :  { %2203 = vsyncadd [#allocation3], 4294959104 }
  0x26   :  { %2204 = dma.done.wait [#allocation6], 16384  }
  0x27   :  { %2205 = vsyncadd [#allocation6], 4294950912  ;;  %v2214_v0 = vmov 0.0   ;;  %v82_v1 = vld [vmem:[%s3054_s3 + $0x8] sm:$0xff]  ;;  %v84_v2 = vld [vmem:[%s3054_s3 + $0x18] sm:$0xff]  ;;  %vm114_vm0 = vcmask 130048   ;;  %v104_v15 = vlaneseq }
  0x28   :  { %203 = vmatprep.mubr.f32.mxu0 %v2214_v0  ;;  %v81_v3 = vld [vmem:[%s3054_s3] sm:$0xff]  ;;  %v1936_v4 = vpack.c.bf16 %v84_v2, %v82_v1  ;;  %v83_v5 = vld [vmem:[%s3054_s3 + $0x10] sm:$0xff]  ;;  %v74_v8 = vld [vmem:[%s3051_s0 + $0x8] sm:$0xff]  ;;  %s2217_s27 = smov 48   ;;  %s2218_s28 = smov 80   ;;  %vm289_vm1 = vcmask 261120  }
  0x29   :  { %v1938_v6 = vpack.c.bf16 %v83_v5, %v81_v3  ;;  %v73_v7 = vld [vmem:[%s3051_s0] sm:$0xff]  ;;  %v75_v9 = vld [vmem:[%s3051_s0 + $0x10] sm:$0xff]  ;;  %v76_v10 = vld [vmem:[%s3051_s0 + $0x18] sm:$0xff]  ;;  %v2372_v16 = vshrl.u32 %v104_v15, 7  ;;  %s2219_s29 = smov 96   ;;  %s2220_s30 = smov 112  }
  0x2a   :  { %1937 = vmatprep.subr.bf16.mxu0 %v1936_v4  ;;  %v77_v11 = vld [vmem:[%s3051_s0 + $0x20] sm:$0xff]  ;;  %v78_v12 = vld [vmem:[%s3051_s0 + $0x28] sm:$0xff]  ;;  %v79_v13 = vld [vmem:[%s3051_s0 + $0x30] sm:$0xff]  ;;  %vm291_vm2 = vcmask 392192   ;;  %vm293_vm3 = vcmask 523264   ;;  %vm295_vm4 = vcmask 654336  }
  0x2b   :  { %1939 = vmatpush1.bf16.msra.mxu0 %v1938_v6  ;;  %v80_v14 = vld [vmem:[%s3051_s0 + $0x38] sm:$0xff]  ;;  %v2375_v17 = vsub.s32 0, %v2372_v16  ;;  %v2380_v18 = vld [vmem:[%s3055_s4] sm:$0x3]  ;;  %s2215_s0 = smov 16   ;;  %s2216_s4 = smov 32  }
  0x2c   :  { %vm297_vm5 = vcmask 785408   ;;  %vm299_vm6 = vcmask 916480   ;;  %v2408_v62 = vsub.s32 2, %v2372_v16  ;;  %v2411_v63 = vsub.s32 3, %v2372_v16 }
  0x2d   :  { %v107_v19 = vrot.slane %v2380_v18, %v2375_v17  ;;  %v2414_v2 = vsub.s32 4, %v2372_v16  ;;  %v2417_v3 = vsub.s32 5, %v2372_v16  ;;  %v2420_v4 = vsub.s32 1, %v2372_v16 }
  0x2e   :  { %1741 = vmatmul.mubr.msk.f32.vlgmr.msra.gmra.mrb[0].mxu0 %vm114_vm0, %v73_v7  ;;  %v2424_v6 = vsub.s32 6, %v2372_v16 }
  0x2f   :  { %209 = vmatprep.mubr.f32.mxu0 %v2214_v0 }
  0x32   :  { %1742 = vmatmul.mubr.msk.f32.gmra.mrb[2].mxu0 %vm114_vm0, %v74_v8  ;;  %v2427_v8 = vsub.s32 7, %v2372_v16 }
  0x33   :  { %215 = vmatprep.mubr.f32.mxu0 %v2214_v0 }
  0x36   :  { %1743 = vmatmul.mubr.msk.f32.gmra.mrb[4].mxu0 %vm114_vm0, %v75_v9 }
  0x37   :  { %221 = vmatprep.mubr.f32.mxu0 %v2214_v0 }
  0x3a   :  { %1744 = vmatmul.mubr.msk.f32.gmra.mrb[6].mxu0 %vm114_vm0, %v76_v10  ;;  %v303_v10 = vld [vmem:[#allocation2 + $0x80] sm:$0xff] }
  0x3b   :  { %227 = vmatprep.mubr.f32.mxu0 %v2214_v0 }
  0x3e   :  { %1745 = vmatmul.mubr.msk.f32.gmra.mrb[8].mxu0 %vm114_vm0, %v77_v11  ;;  %v304_v11 = vld [vmem:[#allocation2 + $0xc0] sm:$0xff] }
  0x3f   :  { %233 = vmatprep.mubr.f32.mxu0 %v2214_v0 }
  0x42   :  { %1746 = vmatmul.mubr.msk.f32.gmra.mrb[10].mxu0 %vm114_vm0, %v78_v12 }
  0x43   :  { %239 = vmatprep.mubr.f32.mxu0 %v2214_v0 }
  0x46   :  { %1747 = vmatmul.mubr.msk.f32.gmra.mrb[12].mxu0 %vm114_vm0, %v79_v13 }
  0x47   :  { %245 = vmatprep.mubr.f32.mxu0 %v2214_v0 }
  0x4a   :  { %1748 = vmatmul.mubr.msk.f32.gmra.mrb[14].mxu0 %vm114_vm0, %v80_v14 }
  0x4b   :  { %857 = vmatprep.mubr.f32.mxu0 %v2214_v0 }
 0x101   :  { %v205_v20 = vpop.f32.mrb[0].mxu0 }
 0x102   :  { %v206_v21 = vadd.f32 %v205_v20, %v107_v19  ;;  %v2384_v22 = vpop.f32.mrb[1].mxu0  ;;  %v332_v20 = vld [vmem:[#allocation2 + $0xc8] sm:$0xff] }
 0x104   :  { %v252_v54 = vmax.f32 %v206_v21, 0.0  ;;  %v359_v21 = vld [vmem:[#allocation2 + $0x90] sm:$0xff] }
 0x105   :  { %v211_v23 = vpop.f32.mrb[2].mxu0 }
 0x106   :  { %v212_v24 = vadd.f32 %v211_v23, %v107_v19  ;;  %v2386_v25 = vpop.f32.mrb[3].mxu0 }
 0x108   :  { %v253_v26 = vmax.f32 %v212_v24, 0.0  ;;  %v360_v24 = vld [vmem:[#allocation2 + $0xd0] sm:$0xff] }
 0x109   :  { %v217_v27 = vpop.f32.mrb[4].mxu0 }
 0x10a   :  { %v218_v28 = vadd.f32 %v217_v27, %v107_v19  ;;  %v2388_v29 = vpop.f32.mrb[5].mxu0  ;;  %261 = vrot.lane.b32.xlu0 %v253_v26, %s2215_s0  ;;  %v387_v26 = vld [vmem:[#allocation2 + $0x98] sm:$0xff] }
 0x10b   :  { %v388_v27 = vld [vmem:[#allocation2 + $0xd8] sm:$0xff] }
 0x10c   :  { %v254_v30 = vmax.f32 %v218_v28, 0.0 }
 0x10d   :  { %v223_v31 = vpop.f32.mrb[6].mxu0 }
 0x10e   :  { %v224_v32 = vadd.f32 %v223_v31, %v107_v19  ;;  %v2391_v33 = vpop.f32.mrb[7].mxu0  ;;  %265 = vrot.lane.b32.xlu0 %v254_v30, %s2216_s4 }
 0x110   :  { %v255_v34 = vmax.f32 %v224_v32, 0.0  ;;  %v415_v32 = vld [vmem:[#allocation2 + $0xa0] sm:$0xff] }
 0x111   :  { %v229_v35 = vpop.f32.mrb[8].mxu0 }
 0x112   :  { %v230_v36 = vadd.f32 %v229_v35, %v107_v19  ;;  %v2394_v37 = vpop.f32.mrb[9].mxu0  ;;  %269 = vrot.lane.b32.xlu1 %v255_v34, %s2217_s27  ;;  %v416_v34 = vld [vmem:[#allocation2 + $0xe0] sm:$0xff]  ;;  %v443_v35 = vld [vmem:[#allocation2 + $0xa8] sm:$0xff] }
 0x114   :  { %v256_v38 = vmax.f32 %v230_v36, 0.0 }
 0x115   :  { %v235_v39 = vpop.f32.mrb[10].mxu0 }
 0x116   :  { %v236_v40 = vadd.f32 %v235_v39, %v107_v19  ;;  %v2396_v41 = vpop.f32.mrb[11].mxu0  ;;  %273 = vrot.lane.b32.xlu1 %v256_v38, %s2210_s19 }
 0x118   :  { %v257_v42 = vmax.f32 %v236_v40, 0.0 }
 0x119   :  { %v241_v43 = vpop.f32.mrb[12].mxu0 }
 0x11a   :  { %v242_v44 = vadd.f32 %v241_v43, %v107_v19  ;;  %v2399_v45 = vpop.f32.mrb[13].mxu0  ;;  %277 = vrot.lane.b32.xlu0 %v257_v42, %s2218_s28  ;;  %v444_v42 = vld [vmem:[#allocation2 + $0xe8] sm:$0xff]  ;;  %v471_v43 = vld [vmem:[#allocation2 + $0xb0] sm:$0xff] }
 0x11c   :  { %v258_v46 = vmax.f32 %v242_v44, 0.0  ;;  %v472_v44 = vld [vmem:[#allocation2 + $0xf0] sm:$0xff] }
 0x11d   :  { %v247_v47 = vpop.f32.mrb[14].mxu0 }
 0x11e   :  { %v248_v48 = vadd.f32 %v247_v47, %v107_v19  ;;  %v2401_v49 = vpop.f32.mrb[15].mxu0  ;;  %281 = vrot.lane.b32.xlu1 %v258_v46, %s2219_s29  ;;  %v331_v19 = vld [vmem:[#allocation2 + $0x88] sm:$0xff] }
 0x120   :  { %v259_v50 = vmax.f32 %v248_v48, 0.0 }
 0x122   :  { %285 = vrot.lane.b32.xlu0 %v259_v50, %s2220_s30 }
 0x17c   :  { %v262_v51 = vpop.permute.xlu0 %261 }
 0x17d   :  { %v288_v56 = vsel %vm114_vm0, %v252_v54, %v262_v51  ;;  %v499_v51 = vld [vmem:[#allocation2 + $0xb8] sm:$0xff] }
 0x180   :  { %v266_v53 = vpop.permute.xlu0 %265 }
 0x181   :  { %v290_v57 = vsel %vm289_vm1, %v288_v56, %v266_v53  ;;  %v302_v53 = vld [vmem:[#allocation2 + $0x40] sm:$0xff] }
 0x184   :  { %v270_v52 = vpop.permute.xlu1 %269 }
 0x185   :  { %v292_v59 = vsel %vm291_vm2, %v290_v57, %v270_v52  ;;  %v301_v52 = vld [vmem:[#allocation2] sm:$0xff] }
 0x188   :  { %v274_v55 = vpop.permute.xlu1 %273 }
 0x189   :  { %v294_v61 = vsel %vm293_vm3, %v292_v59, %v274_v55  ;;  %v329_v59 = vld [vmem:[#allocation2 + $0x8] sm:$0xff] }
 0x18c   :  { %v278_v58 = vpop.permute.xlu0 %277 }
 0x18d   :  { %v296_v1 = vsel %vm295_vm4, %v294_v61, %v278_v58  ;;  %v500_v58 = vld [vmem:[#allocation2 + $0xf8] sm:$0xff] }
 0x190   :  { %v282_v60 = vpop.permute.xlu1 %281 }
 0x191   :  { %v298_v5 = vsel %vm297_vm5, %v296_v1, %v282_v60 }
 0x194   :  { %v286_v7 = vpop.permute.xlu0 %285 }
 0x195   :  { %v300_v9 = vsel %vm299_vm6, %v298_v5, %v286_v7  ;;  %v330_v7 = vld [vmem:[#allocation2 + $0x48] sm:$0xff] }
 0x196   :  { %v2430_v12 = vrot.slane %v300_v9, %v2375_v17  ;;  %v2433_v13 = vrot.slane %v300_v9, %v2420_v4  ;;  %v2436_v14 = vrot.slane %v300_v9, %v2408_v62  ;;  %v2439_v15 = vrot.slane %v300_v9, %v2411_v63 }
 0x197   :  { %v2442_v16 = vrot.slane %v300_v9, %v2414_v2  ;;  %v2445_v23 = vrot.slane %v300_v9, %v2417_v3  ;;  %v2448_v28 = vrot.slane %v300_v9, %v2424_v6  ;;  %v2453_v36 = vrot.slane %v300_v9, %v2427_v8  ;;  %v357_v9 = vld [vmem:[#allocation2 + $0x10] sm:$0xff] }
 0x198   :  { %v315_v30 = vmul.f32 %v2430_v12, %v303_v10  ;;  %v316_v31 = vmul.f32 %v2430_v12, %v304_v11  ;;  %v343_v38 = vmul.f32 %v2433_v13, %v331_v19  ;;  %v344_v39 = vmul.f32 %v2433_v13, %v332_v20 }
 0x199   :  { %v371_v40 = vmul.f32 %v2436_v14, %v359_v21  ;;  %v372_v48 = vmul.f32 %v2436_v14, %v360_v24  ;;  %v399_v50 = vmul.f32 %v2439_v15, %v387_v26  ;;  %v400_v54 = vmul.f32 %v2439_v15, %v388_v27  ;;  %v358_v21 = vld [vmem:[#allocation2 + $0x50] sm:$0xff]  ;;  %v385_v24 = vld [vmem:[#allocation2 + $0x18] sm:$0xff] }
 0x19a   :  { %v323_v46 = vmax.f32 %v315_v30, 0.0  ;;  %v324_v47 = vmax.f32 %v316_v31, 0.0  ;;  %v427_v55 = vmul.f32 %v2442_v16, %v415_v32  ;;  %v428_v56 = vmul.f32 %v2442_v16, %v416_v34  ;;  %v386_v32 = vld [vmem:[#allocation2 + $0x58] sm:$0xff]  ;;  %v413_v34 = vld [vmem:[#allocation2 + $0x20] sm:$0xff] }
 0x19b   :  { %v455_v57 = vmul.f32 %v2445_v23, %v443_v35  ;;  %v456_v1 = vmul.f32 %v2445_v23, %v444_v42  ;;  %v2466_v5 = vmul.f32 %v2448_v28, %v471_v43  ;;  %v2469_v10 = vmul.f32 %v2448_v28, %v472_v44  ;;  %v414_v43 = vld [vmem:[#allocation2 + $0x60] sm:$0xff]  ;;  %v441_v44 = vld [vmem:[#allocation2 + $0x28] sm:$0xff] }
 0x19c   :  { %v351_v60 = vmax.f32 %v323_v46, %v343_v38  ;;  %v352_v61 = vmax.f32 %v324_v47, %v344_v39  ;;  %v511_v11 = vmul.f32 %v2453_v36, %v499_v51  ;;  %v313_v19 = vmul.f32 %v2430_v12, %v301_v52  ;;  %v469_v52 = vld [vmem:[#allocation2 + $0x30] sm:$0xff] }
 0x19d   :  { %v314_v20 = vmul.f32 %v2430_v12, %v302_v53  ;;  %v512_v30 = vmul.f32 %v2453_v36, %v500_v58  ;;  %v341_v31 = vmul.f32 %v2433_v13, %v329_v59  ;;  %v342_v39 = vmul.f32 %v2433_v13, %v330_v7  ;;  %v308_v7 = vld [vmem:[#allocation2 + $0x1c0] sm:$0xff] }
 0x19e   :  { %v379_v26 = vmax.f32 %v351_v60, %v371_v40  ;;  %v380_v27 = vmax.f32 %v352_v61, %v372_v48  ;;  %v321_v35 = vmax.f32 %v313_v19, 0.0  ;;  %v369_v42 = vmul.f32 %v2436_v14, %v357_v9  ;;  %v442_v48 = vld [vmem:[#allocation2 + $0x68] sm:$0xff]  ;;  %v307_v61 = vld [vmem:[#allocation2 + $0x180] sm:$0xff] }
 0x19f   :  { %v322_v38 = vmax.f32 %v314_v20, 0.0  ;;  %v370_v51 = vmul.f32 %v2436_v14, %v358_v21  ;;  %v397_v40 = vmul.f32 %v2439_v15, %v385_v24  ;;  %v398_v59 = vmul.f32 %v2439_v15, %v386_v32  ;;  %v336_v21 = vld [vmem:[#allocation2 + $0x1c8] sm:$0xff] }
 0x1a0   :  { %v407_v46 = vmax.f32 %v379_v26, %v399_v50  ;;  %v408_v47 = vmax.f32 %v380_v27, %v400_v54  ;;  %v349_v53 = vmax.f32 %v321_v35, %v341_v31  ;;  %v425_v60 = vmul.f32 %v2442_v16, %v413_v34  ;;  %v335_v54 = vld [vmem:[#allocation2 + $0x188] sm:$0xff] }
 0x1a1   :  { %v350_v58 = vmax.f32 %v322_v38, %v342_v39  ;;  %v426_v20 = vmul.f32 %v2442_v16, %v414_v43  ;;  %v453_v50 = vmul.f32 %v2445_v23, %v441_v44  ;;  %v454_v27 = vmul.f32 %v2445_v23, %v442_v48 }
 0x1a2   :  { %v435_v19 = vmax.f32 %v407_v46, %v427_v55  ;;  %v436_v9 = vmax.f32 %v408_v47, %v428_v56  ;;  %v377_v26 = vmax.f32 %v349_v53, %v369_v42  ;;  %v481_v31 = vmul.f32 %v2448_v28, %v469_v52  ;;  %v363_v55 = vld [vmem:[#allocation2 + $0x190] sm:$0xff] }
 0x1a3   :  { %v378_v24 = vmax.f32 %v350_v58, %v370_v51  ;;  %v319_v34 = vmul.f32 %v2430_v12, %v307_v61  ;;  %v320_v38 = vmul.f32 %v2430_v12, %v308_v7  ;;  %v364_v56 = vld [vmem:[#allocation2 + $0x1d0] sm:$0xff]  ;;  %v347_v44 = vmul.f32 %v2433_v13, %v335_v54 }
 0x1a4   :  { %v463_v35 = vmax.f32 %v435_v19, %v455_v57  ;;  %v464_v32 = vmax.f32 %v436_v9, %v456_v1  ;;  %v405_v39 = vmax.f32 %v377_v26, %v397_v40  ;;  %v348_v46 = vmul.f32 %v2433_v13, %v336_v21  ;;  %v470_v51 = vld [vmem:[#allocation2 + $0x70] sm:$0xff]  ;;  %v391_v1 = vld [vmem:[#allocation2 + $0x198] sm:$0xff] }
 0x1a5   :  { %v406_v43 = vmax.f32 %v378_v24, %v398_v59  ;;  %v327_v48 = vmax.f32 %v319_v34, 0.0  ;;  %v328_v57 = vmax.f32 %v320_v38, 0.0  ;;  %v375_v58 = vmul.f32 %v2436_v14, %v363_v55  ;;  %v392_v40 = vld [vmem:[#allocation2 + $0x1d8] sm:$0xff]  ;;  %v420_v24 = vld [vmem:[#allocation2 + $0x1e0] sm:$0xff]  ;;  %v447_v34 = vld [vmem:[#allocation2 + $0x1a8] sm:$0xff] }
 0x1a6   :  { %v491_v42 = vmax.f32 %v463_v35, %v2466_v5  ;;  %v492_v47 = vmax.f32 %v464_v32, %v2469_v10  ;;  %v433_v52 = vmax.f32 %v405_v39, %v425_v60  ;;  %v376_v61 = vmul.f32 %v2436_v14, %v364_v56  ;;  %v497_v19 = vld [vmem:[#allocation2 + $0x38] sm:$0xff]  ;;  %v305_v39 = vld [vmem:[#allocation2 + $0x100] sm:$0xff] }
 0x1a7   :  { %v434_v53 = vmax.f32 %v406_v43, %v426_v20  ;;  %v498_v9 = vld [vmem:[#allocation2 + $0x78] sm:$0xff]  ;;  %v355_v5 = vmax.f32 %v327_v48, %v347_v44  ;;  %v356_v54 = vmax.f32 %v328_v57, %v348_v46  ;;  %v482_v26 = vmul.f32 %v2448_v28, %v470_v51  ;;  %v419_v20 = vld [vmem:[#allocation2 + $0x1a0] sm:$0xff]  ;;  %v476_v51 = vld [vmem:[#allocation2 + $0x1f0] sm:$0xff] }
 0x1a8   :  { %v2494_v59 = vmax.f32 %v491_v42, %v511_v11  ;;  %v2496_v7 = vmax.f32 %v492_v47, %v512_v30  ;;  %v461_v10 = vmax.f32 %v433_v52, %v453_v50  ;;  %v403_v60 = vmul.f32 %v2439_v15, %v391_v1  ;;  %v475_v47 = vld [vmem:[#allocation2 + $0x1b0] sm:$0xff]  ;;  %v306_v48 = vld [vmem:[#allocation2 + $0x140] sm:$0xff]  ;;  %v333_v52 = vld [vmem:[#allocation2 + $0x108] sm:$0xff] }
 0x1a9   :  { %v462_v21 = vmax.f32 %v434_v53, %v454_v27  ;;  %v383_v32 = vmax.f32 %v355_v5, %v375_v58  ;;  %v384_v11 = vmax.f32 %v356_v54, %v376_v61  ;;  %v404_v30 = vmul.f32 %v2439_v15, %v392_v40  ;;  %v448_v27 = vld [vmem:[#allocation2 + $0x1e8] sm:$0xff]  ;;  %v503_v40 = vld [vmem:[#allocation2 + $0x1b8] sm:$0xff] }
 0x1aa   :  { %v2040_v35 = vpack.i.bf16 %v2496_v7, %v2494_v59  ;;  %v489_v38 = vmax.f32 %v461_v10, %v481_v31  ;;  %v509_v56 = vmul.f32 %v2453_v36, %v497_v19  ;;  %v510_v50 = vmul.f32 %v2453_v36, %v498_v9  ;;  %v504_v19 = vld [vmem:[#allocation2 + $0x1f8] sm:$0xff]  ;;  %v334_v5 = vld [vmem:[#allocation2 + $0x148] sm:$0xff] }
 0x1ab   :  { %v490_v55 = vmax.f32 %v462_v21, %v482_v26  ;;  %v411_v43 = vmax.f32 %v383_v32, %v403_v60  ;;  %v412_v44 = vmax.f32 %v384_v11, %v404_v30  ;;  %v431_v46 = vmul.f32 %v2442_v16, %v419_v20  ;;  %v361_v60 = vld [vmem:[#allocation2 + $0x110] sm:$0xff] }
 0x1ac   :  { %2041 = vrot.lane.b32.xlu0 %v2040_v35, %s2210_s19  ;;  %v432_v42 = vmul.f32 %v2442_v16, %v420_v24  ;;  %v2508_v57 = vmax.f32 %v489_v38, %v509_v56  ;;  %v459_v1 = vmul.f32 %v2445_v23, %v447_v34  ;;  %v460_v61 = vmul.f32 %v2445_v23, %v448_v27  ;;  %v362_v11 = vld [vmem:[#allocation2 + $0x150] sm:$0xff]  ;;  %v389_v56 = vld [vmem:[#allocation2 + $0x118] sm:$0xff] }
 0x1ad   :  { %v2510_v31 = vmax.f32 %v490_v55, %v510_v50  ;;  %v439_v53 = vmax.f32 %v411_v43, %v431_v46  ;;  %v317_v9 = vmul.f32 %v2430_v12, %v305_v39  ;;  %v487_v10 = vmul.f32 %v2448_v28, %v475_v47  ;;  %v390_v43 = vld [vmem:[#allocation2 + $0x158] sm:$0xff] }
 0x1ae   :  { %v440_v58 = vmax.f32 %v412_v44, %v432_v42  ;;  %v488_v21 = vmul.f32 %v2448_v28, %v476_v51  ;;  %v318_v26 = vmul.f32 %v2430_v12, %v306_v48  ;;  %v345_v32 = vmul.f32 %v2433_v13, %v333_v52  ;;  %v417_v42 = vld [vmem:[#allocation2 + $0x120] sm:$0xff] }
 0x1af   :  { %v2035_v54 = vpack.i.bf16 %v2510_v31, %v2508_v57  ;;  %v467_v20 = vmax.f32 %v439_v53, %v459_v1  ;;  %v325_v35 = vmax.f32 %v317_v9, 0.0  ;;  %v515_v30 = vmul.f32 %v2453_v36, %v503_v40  ;;  %v418_v52 = vld [vmem:[#allocation2 + $0x160] sm:$0xff]  ;;  %v446_v9 = vld [vmem:[#allocation2 + $0x168] sm:$0xff] }
 0x1b0   :  { %v468_v24 = vmax.f32 %v440_v58, %v460_v61  ;;  %v516_v34 = vmul.f32 %v2453_v36, %v504_v19  ;;  %v326_v38 = vmax.f32 %v318_v26, 0.0  ;;  %v346_v55 = vmul.f32 %v2433_v13, %v334_v5  ;;  %v445_v58 = vld [vmem:[#allocation2 + $0x128] sm:$0xff]  ;;  %v474_v26 = vld [vmem:[#allocation2 + $0x170] sm:$0xff] }
 0x1b1   :  { %2036 = vrot.lane.b32.xlu1 %v2035_v54, %s2210_s19  ;;  %v495_v50 = vmax.f32 %v467_v20, %v487_v10  ;;  %v353_v12 = vmax.f32 %v325_v35, %v345_v32  ;;  %v373_v39 = vmul.f32 %v2436_v14, %v361_v60  ;;  %v374_v46 = vmul.f32 %v2436_v14, %v362_v11  ;;  %v473_v14 = vld [vmem:[#allocation2 + $0x130] sm:$0xff]  ;;  %v502_v32 = vld [vmem:[#allocation2 + $0x178] sm:$0xff] }
 0x1b2   :  { %v496_v27 = vmax.f32 %v468_v24, %v488_v21  ;;  %v354_v44 = vmax.f32 %v326_v38, %v346_v55  ;;  %v401_v1 = vmul.f32 %v2439_v15, %v389_v56  ;;  %v402_v13 = vmul.f32 %v2439_v15, %v390_v43  ;;  %v501_v15 = vld [vmem:[#allocation2 + $0x138] sm:$0xff] }
 0x1b3   :  { %v523_v47 = vmax.f32 %v495_v50, %v515_v30  ;;  %v381_v48 = vmax.f32 %v353_v12, %v373_v39  ;;  %v429_v19 = vmul.f32 %v2442_v16, %v417_v42  ;;  %v430_v54 = vmul.f32 %v2442_v16, %v418_v52 }
 0x1b4   :  { %v524_v51 = vmax.f32 %v496_v27, %v516_v34  ;;  %v382_v53 = vmax.f32 %v354_v44, %v374_v46  ;;  %v457_v21 = vmul.f32 %v2445_v23, %v445_v58  ;;  %v458_v20 = vmul.f32 %v2445_v23, %v446_v9 }
 0x1b5   :  { %v409_v40 = vmax.f32 %v381_v48, %v401_v1  ;;  %v485_v35 = vmul.f32 %v2448_v28, %v473_v14  ;;  %v486_v30 = vmul.f32 %v2448_v28, %v474_v26  ;;  %v513_v16 = vmul.f32 %v2453_v36, %v501_v15  ;;  %v90_v14 = vld [vmem:[%s3056_s5 + $0x20] sm:$0xff]  ;;  %v92_v15 = vld [vmem:[%s3056_s5 + $0x30] sm:$0xff] }
 0x1b6   :  { %v2050_v61 = vpack.i.bf16 %v524_v51, %v523_v47  ;;  %v410_v5 = vmax.f32 %v382_v53, %v402_v13  ;;  %v514_v55 = vmul.f32 %v2453_v36, %v502_v32  ;;  %v94_v32 = vld [vmem:[%s3056_s5 + $0x40] sm:$0xff] }
 0x1b7   :  { %v437_v10 = vmax.f32 %v409_v40, %v429_v19  ;;  %v87_v40 = vld [vmem:[%s3056_s5 + $0x8] sm:$0xff] }
 0x1b8   :  { %2051 = vrot.lane.b32.xlu0 %v2050_v61, %s2210_s19  ;;  %v438_v60 = vmax.f32 %v410_v5, %v430_v54  ;;  %v89_v5 = vld [vmem:[%s3056_s5 + $0x18] sm:$0xff] }
 0x1b9   :  { %v465_v24 = vmax.f32 %v437_v10, %v457_v21  ;;  %v91_v10 = vld [vmem:[%s3056_s5 + $0x28] sm:$0xff] }
 0x1ba   :  { %v466_v11 = vmax.f32 %v438_v60, %v458_v20  ;;  %v1948_v20 = vpack.c.bf16 %v91_v10, %v90_v14  ;;  %v735_v10 = vld [vmem:[%s3058_s7 + $0x18] sm:$0xff] }
 0x1bb   :  { %v493_v34 = vmax.f32 %v465_v24, %v485_v35  ;;  %v93_v24 = vld [vmem:[%s3056_s5 + $0x38] sm:$0xff] }
 0x1bc   :  { %v494_v38 = vmax.f32 %v466_v11, %v486_v30  ;;  %v1952_v35 = vpack.c.bf16 %v93_v24, %v92_v15  ;;  %v95_v11 = vld [vmem:[%s3056_s5 + $0x48] sm:$0xff] }
 0x1bd   :  { %v521_v56 = vmax.f32 %v493_v34, %v513_v16  ;;  %v1956_v30 = vpack.c.bf16 %v95_v11, %v94_v32  ;;  %v96_v34 = vld [vmem:[%s3056_s5 + $0x50] sm:$0xff]  ;;  %v97_v16 = vld [vmem:[%s3056_s5 + $0x58] sm:$0xff] }
 0x1be   :  { %v522_v50 = vmax.f32 %v494_v38, %v514_v55  ;;  %v1960_v38 = vpack.c.bf16 %v97_v16, %v96_v34  ;;  %v98_v55 = vld [vmem:[%s3056_s5 + $0x60] sm:$0xff]  ;;  %v738_v32 = vld [vmem:[%s3058_s7 + $0x30] sm:$0xff] }
 0x1c0   :  { %v2045_v27 = vpack.i.bf16 %v522_v50, %v521_v56 }
 0x1c2   :  { %2046 = vrot.lane.b32.xlu1 %v2045_v27, %s2210_s19 }
 0x21e   :  { %v2042_v23 = vpop.permute.xlu0 %2041 }
 0x21f   :  { %v2044_v12 = vunpack.i.h.bf16 %v2042_v23  ;;  %v2043_v39 = vunpack.i.l.bf16 %v2042_v23 }
 0x221   :  { %v2540_v43 = vmax.f32 %v2496_v7, %v2044_v12  ;;  %v2543_v44 = vmax.f32 %v2494_v59, %v2043_v39  ;;  %v100_v39 = vld [vmem:[%s3056_s5 + $0x70] sm:$0xff] }
 0x223   :  { %v2037_v28 = vpop.permute.xlu1 %2036  ;;  %v2060_v46 = vpack.i.bf16 %v2540_v43, %v2543_v44 }
 0x224   :  { %v2039_v42 = vunpack.i.h.bf16 %v2037_v28  ;;  %v2038_v36 = vunpack.i.l.bf16 %v2037_v28  ;;  %v101_v28 = vld [vmem:[%s3056_s5 + $0x78] sm:$0xff] }
 0x225   :  { %2061 = vrot.lane.b32.xlu0 %v2060_v46, %s2216_s4  ;;  %v1968_v46 = vpack.c.bf16 %v101_v28, %v100_v39 }
 0x226   :  { %v2549_v48 = vmax.f32 %v2510_v31, %v2039_v42  ;;  %v2552_v1 = vmax.f32 %v2508_v57, %v2038_v36  ;;  %v86_v57 = vld [vmem:[%s3056_s5] sm:$0xff] }
 0x227   :  { %v1940_v9 = vpack.c.bf16 %v87_v40, %v86_v57 }
 0x228   :  { %v2055_v7 = vpack.i.bf16 %v2549_v48, %v2552_v1 }
 0x229   :  { %1941 = vmatprep.subr.bf16.mxu1 %v1940_v9 }
 0x22a   :  { %v2052_v52 = vpop.permute.xlu0 %2051  ;;  %2056 = vrot.lane.b32.xlu1 %v2055_v7, %s2216_s4  ;;  %1943 = vmatpush3.bf16.msra.mxu1 %v1940_v9 }
 0x22b   :  { %v2054_v59 = vunpack.i.h.bf16 %v2052_v52  ;;  %v2053_v53 = vunpack.i.l.bf16 %v2052_v52 }
 0x22d   :  { %v2557_v13 = vmax.f32 %v524_v51, %v2054_v59  ;;  %v2559_v58 = vmax.f32 %v523_v47, %v2053_v53  ;;  %v88_v51 = vld [vmem:[%s3056_s5 + $0x10] sm:$0xff] }
 0x22e   :  { %v1944_v54 = vpack.c.bf16 %v89_v5, %v88_v51 }
 0x22f   :  { %v2070_v61 = vpack.i.bf16 %v2557_v13, %v2559_v58 }
 0x230   :  { %1945 = vmatprep.subr.bf16.mxu1 %v1944_v54 }
 0x231   :  { %2071 = vrot.lane.b32.xlu0 %v2070_v61, %s2216_s4  ;;  %1947 = vmatpush3.bf16.msra.mxu1 %v1944_v54 }
 0x232   :  { %1949 = vmatprep.subr.bf16.mxu1 %v1948_v20 }
 0x234   :  { %v2047_v31 = vpop.permute.xlu1 %2046 }
 0x235   :  { %v2049_v47 = vunpack.i.h.bf16 %v2047_v31  ;;  %v2048_v19 = vunpack.i.l.bf16 %v2047_v31  ;;  %1951 = vmatpush3.bf16.msra.mxu1 %v1948_v20 }
 0x236   :  { %1953 = vmatprep.subr.bf16.mxu1 %v1952_v35 }
 0x237   :  { %v546_v21 = vmax.f32 %v522_v50, %v2049_v47  ;;  %v545_v26 = vmax.f32 %v521_v56, %v2048_v19  ;;  %v99_v56 = vld [vmem:[%s3056_s5 + $0x68] sm:$0xff] }
 0x238   :  { %v1964_v50 = vpack.c.bf16 %v99_v56, %v98_v55 }
 0x239   :  { %v2065_v60 = vpack.i.bf16 %v546_v21, %v545_v26  ;;  %1955 = vmatpush3.bf16.msra.mxu1 %v1952_v35  ;;  %v736_v35 = vld [vmem:[%s3058_s7 + $0x20] sm:$0xff] }
 0x23a   :  { %1957 = vmatprep.subr.bf16.mxu1 %v1956_v30  ;;  %v1978_v11 = vpack.c.bf16 %v738_v32, %v736_v35 }
 0x23b   :  { %2066 = vrot.lane.b32.xlu1 %v2065_v60, %s2216_s4  ;;  %v734_v60 = vld [vmem:[%s3058_s7 + $0x10] sm:$0xff] }
 0x23d   :  { %1959 = vmatpush3.bf16.msra.mxu1 %v1956_v30 }
 0x23e   :  { %1961 = vmatprep.subr.bf16.mxu1 %v1960_v38 }
 0x241   :  { %1963 = vmatpush3.bf16.msra.mxu1 %v1960_v38 }
 0x242   :  { %1965 = vmatprep.subr.bf16.mxu1 %v1964_v50 }
 0x245   :  { %1967 = vmatpush3.bf16.msra.mxu1 %v1964_v50 }
 0x246   :  { %1969 = vmatprep.subr.bf16.mxu1 %v1968_v46 }
 0x249   :  { %1971 = vmatpush3.bf16.msra.mxu1 %v1968_v46 }
 0x297   :  { %v2062_v27 = vpop.permute.xlu0 %2061 }
 0x298   :  { %v2064_v23 = vunpack.i.h.bf16 %v2062_v27  ;;  %v2063_v12 = vunpack.i.l.bf16 %v2062_v27 }
 0x29a   :  { %v568_v42 = vmax.f32 %v2540_v43, %v2064_v23  ;;  %v567_v36 = vmax.f32 %v2543_v44, %v2063_v12 }
 0x29c   :  { %v2057_v7 = vpop.permute.xlu1 %2056  ;;  %v2080_v52 = vpack.i.bf16 %v568_v42, %v567_v36 }
 0x29d   :  { %v2059_v59 = vunpack.i.h.bf16 %v2057_v7  ;;  %v2058_v53 = vunpack.i.l.bf16 %v2057_v7 }
 0x29e   :  { %2081 = vrot.lane.b32.xlu0 %v2080_v52, %s2215_s0 }
 0x29f   :  { %v566_v61 = vmax.f32 %v2549_v48, %v2059_v59  ;;  %v565_v31 = vmax.f32 %v2552_v1, %v2058_v53  ;;  %v733_v1 = vld [vmem:[%s3058_s7 + $0x8] sm:$0xff] }
 0x2a1   :  { %v2075_v57 = vpack.i.bf16 %v566_v61, %v565_v31 }
 0x2a3   :  { %v2072_v40 = vpop.permute.xlu0 %2071  ;;  %2076 = vrot.lane.b32.xlu1 %v2075_v57, %s2215_s0 }
 0x2a4   :  { %v2074_v51 = vunpack.i.h.bf16 %v2072_v40  ;;  %v2073_v43 = vunpack.i.l.bf16 %v2072_v40 }
 0x2a6   :  { %v572_v44 = vmax.f32 %v2557_v13, %v2074_v51  ;;  %v571_v47 = vmax.f32 %v2559_v58, %v2073_v43  ;;  %v732_v13 = vld [vmem:[%s3058_s7] sm:$0xff]  ;;  %v1972_v58 = vpack.c.bf16 %v735_v10, %v733_v1 }
 0x2a7   :  { %v1974_v15 = vpack.c.bf16 %v734_v60, %v732_v13  ;;  %v1749_v43 = vld [vmem:[%s3057_s6] ss:$0 sm:$0xff] }
 0x2a8   :  { %v2090_v19 = vpack.i.bf16 %v572_v44, %v571_v47  ;;  %1973 = vmatprep.subr.bf16.mxu0 %v1972_v58 }
 0x2a9   :  { %1975 = vmatpush1.bf16.msra.mxu0 %v1974_v15 }
 0x2aa   :  { %2091 = vrot.lane.b32.xlu0 %v2090_v19, %s2215_s0 }
 0x2ad   :  { %v2067_v9 = vpop.permute.xlu1 %2066 }
 0x2ae   :  { %v2069_v5 = vunpack.i.h.bf16 %v2067_v9  ;;  %v2068_v54 = vunpack.i.l.bf16 %v2067_v9 }
 0x2b0   :  { %v570_v14 = vmax.f32 %v546_v21, %v2069_v5  ;;  %v569_v48 = vmax.f32 %v545_v26, %v2068_v54  ;;  %v737_v21 = vld [vmem:[%s3058_s7 + $0x28] sm:$0xff]  ;;  %v739_v26 = vld [vmem:[%s3058_s7 + $0x38] sm:$0xff]  ;;  %s2221_s7 = smov [#allocation7]  }
 0x2b1   :  { %v1976_v24 = vpack.c.bf16 %v739_v26, %v737_v21 }
 0x2b2   :  { %v2085_v20 = vpack.i.bf16 %v570_v14, %v569_v48 }
 0x2b3   :  { %1977 = vmatprep.subr.bf16.mxu0 %v1976_v24 }
 0x2b4   :  { %2086 = vrot.lane.b32.xlu1 %v2085_v20, %s2215_s0  ;;  %1979 = vmatpush1.bf16.msra.mxu0 %v1978_v11  ;;  %s1728_s0 = sshll.u32 %s2221_s7, 4  ;;  %s1729_s0 = int_to_ptr.vmem [resolvable:$true] %s1728_s0 }
 0x2b5   :  { %p2185_p3 = scmp.lt.s32.totalorder %s1729_s0, %s1729_s0 }
 0x310   :  { %v2082_v30 = vpop.permute.xlu0 %2081 }
 0x311   :  { %v2083_v16 = vunpack.i.l.bf16 %v2082_v30  ;;  %v2084_v27 = vunpack.i.h.bf16 %v2082_v30 }
 0x313   :  { %v591_v23 = vmax.f32 %v567_v36, %v2083_v16  ;;  %v592_v12 = vmax.f32 %v568_v42, %v2084_v27  ;;  %v111_v36 = vrot.slane %v2380_v18, %v2420_v4  ;;  %v740_v27 = vld [vmem:[%s3059_s8] sm:$0x3] }
 0x315   :  { %v2077_v34 = vpop.permute.xlu1 %2076  ;;  %v214_v42 = vadd.f32 %v2386_v25, %v111_v36  ;;  %v226_v5 = vadd.f32 %v2391_v33, %v111_v36  ;;  %v232_v60 = vadd.f32 %v2394_v37, %v111_v36  ;;  %v250_v35 = vadd.f32 %v2401_v49, %v111_v36 }
 0x316   :  { %v2079_v38 = vunpack.i.h.bf16 %v2077_v34  ;;  %v2078_v55 = vunpack.i.l.bf16 %v2077_v34  ;;  %v244_v32 = vadd.f32 %v2399_v45, %v111_v36 }
 0x318   :  { %v590_v56 = vmax.f32 %v566_v61, %v2079_v38  ;;  %v589_v50 = vmax.f32 %v565_v31, %v2078_v55  ;;  %v208_v31 = vadd.f32 %v2384_v22, %v111_v36 }
 0x31a   :  { %1860 = vmatprep.mubr.f32.mxu1 %v589_v50 }
 0x31b   :  { %1861 = vmatmul.mubr.f32.vlgmr.msra.gmra.mrb[0].mxu1 %v590_v56 }
 0x31c   :  { %1863 = vmatprep.mubr.f32.mxu1 %v591_v23  ;;  %v2092_v39 = vpop.permute.xlu0 %2091  ;;  %v762_v23 = vrot.slane %v740_v27, %v2375_v17  ;;  %v1003_v27 = vld [vmem:[#allocation5 + $0x190] sm:$0xff] }
 0x31d   :  { %v2093_v46 = vunpack.i.l.bf16 %v2092_v39  ;;  %v2094_v53 = vunpack.i.h.bf16 %v2092_v39 }
 0x31f   :  { %1864 = vmatmul.mubr.f32.gmra.mrb[2].mxu1 %v592_v12  ;;  %v595_v40 = vmax.f32 %v571_v47, %v2093_v46  ;;  %v596_v61 = vmax.f32 %v572_v44, %v2094_v53  ;;  %v220_v44 = vadd.f32 %v2388_v29, %v111_v36  ;;  %v238_v29 = vadd.f32 %v2396_v41, %v111_v36 }
 0x326   :  { %v2087_v28 = vpop.permute.xlu1 %2086 }
 0x327   :  { %v2089_v7 = vunpack.i.h.bf16 %v2087_v28  ;;  %v2088_v52 = vunpack.i.l.bf16 %v2087_v28 }
 0x329   :  { %v593_v59 = vmax.f32 %v569_v48, %v2088_v52  ;;  %v594_v57 = vmax.f32 %v570_v14, %v2089_v7 }
 0x32b   :  { %1866 = vmatprep.mubr.f32.mxu1 %v593_v59 }
 0x32c   :  { %1867 = vmatmul.mubr.f32.gmra.mrb[4].mxu1 %v594_v57 }
 0x32d   :  { %1869 = vmatprep.mubr.f32.mxu1 %v595_v40 }
 0x330   :  { %1870 = vmatmul.mubr.f32.gmra.mrb[6].mxu1 %v596_v61 }
 0x3ee   :  { %v1862_v51 = vpop.f32.mrb[0].mxu1 }
 0x3ef   :  { %v703_v19 = vadd.f32 %v1862_v51, %v214_v42  ;;  %v663_v9 = vpop.f32.mrb[1].mxu1 }
 0x3f0   :  { %v702_v47 = vadd.f32 %v663_v9, %v208_v31 }
 0x3f1   :  { %v717_v1 = vadd.f32 %v1749_v43, %v703_v19 }
 0x3f2   :  { %v716_v54 = vadd.f32 %v1749_v43, %v702_v47  ;;  %v1865_v14 = vpop.f32.mrb[2].mxu1 }
 0x3f3   :  { %v705_v48 = vadd.f32 %v1865_v14, %v226_v5  ;;  %v673_v18 = vpop.f32.mrb[3].mxu1  ;;  %v725_v22 = vmax.f32 %v717_v1, 0.0 }
 0x3f4   :  { %v724_v25 = vmax.f32 %v716_v54, 0.0  ;;  %v704_v10 = vadd.f32 %v673_v18, %v220_v44 }
 0x3f5   :  { %v719_v33 = vadd.f32 %v1749_v43, %v705_v48 }
 0x3f6   :  { %1750 = vmatmul.mubr.msk.f32.vlgmr.msra.gmra.mrb[16].mxu0 %vm289_vm1, %v724_v25  ;;  %v718_v13 = vadd.f32 %v1749_v43, %v704_v10 }
 0x3f7   :  { %863 = vmatprep.mubr.f32.mxu0 %v2214_v0  ;;  %v727_v21 = vmax.f32 %v719_v33, 0.0 }
 0x3f8   :  { %v726_v58 = vmax.f32 %v718_v13, 0.0 }
 0x3fa   :  { %1751 = vmatmul.mubr.msk.f32.gmra.mrb[18].mxu0 %vm289_vm1, %v725_v22 }
 0x3fb   :  { %869 = vmatprep.mubr.f32.mxu0 %v2214_v0 }
 0x3fe   :  { %1752 = vmatmul.mubr.msk.f32.gmra.mrb[20].mxu0 %vm289_vm1, %v726_v58 }
 0x3ff   :  { %875 = vmatprep.mubr.f32.mxu0 %v2214_v0  ;;  %v1868_v26 = vpop.f32.mrb[4].mxu1 }
 0x400   :  { %v707_v20 = vadd.f32 %v1868_v26, %v238_v29  ;;  %v683_v15 = vpop.f32.mrb[5].mxu1 }
 0x401   :  { %v706_v24 = vadd.f32 %v683_v15, %v232_v60 }
 0x402   :  { %1753 = vmatmul.mubr.msk.f32.gmra.mrb[22].mxu0 %vm289_vm1, %v727_v21  ;;  %v721_v16 = vadd.f32 %v1749_v43, %v707_v20 }
 0x403   :  { %881 = vmatprep.mubr.f32.mxu0 %v2214_v0  ;;  %v720_v11 = vadd.f32 %v1749_v43, %v706_v24  ;;  %v1871_v30 = vpop.f32.mrb[6].mxu1  ;;  %v946_v24 = vld [vmem:[#allocation5 + $0x100] sm:$0xff] }
 0x404   :  { %v709_v41 = vadd.f32 %v1871_v30, %v250_v35  ;;  %v693_v34 = vpop.f32.mrb[7].mxu1  ;;  %v729_v55 = vmax.f32 %v721_v16, 0.0  ;;  %v947_v35 = vld [vmem:[#allocation5 + $0x180] sm:$0xff] }
 0x405   :  { %v728_v38 = vmax.f32 %v720_v11, 0.0  ;;  %v708_v37 = vadd.f32 %v693_v34, %v244_v32 }
 0x406   :  { %v723_v49 = vadd.f32 %v1749_v43, %v709_v41 }
 0x407   :  { %1754 = vmatmul.mubr.msk.f32.gmra.mrb[24].mxu0 %vm289_vm1, %v728_v38  ;;  %v722_v56 = vadd.f32 %v1749_v43, %v708_v37 }
 0x408   :  { %887 = vmatprep.mubr.f32.mxu0 %v2214_v0  ;;  %v731_v45 = vmax.f32 %v723_v49, 0.0  ;;  %v975_v49 = vld [vmem:[#allocation5 + $0x188] sm:$0xff] }
 0x409   :  { %v730_v50 = vmax.f32 %v722_v56, 0.0  ;;  %v974_v56 = vld [vmem:[#allocation5 + $0x108] sm:$0xff] }
 0x40b   :  { %1755 = vmatmul.mubr.msk.f32.gmra.mrb[26].mxu0 %vm289_vm1, %v729_v55 }
 0x40c   :  { %893 = vmatprep.mubr.f32.mxu0 %v2214_v0 }
 0x40f   :  { %1756 = vmatmul.mubr.msk.f32.gmra.mrb[28].mxu0 %vm289_vm1, %v730_v50 }
 0x410   :  { %899 = vmatprep.mubr.f32.mxu0 %v2214_v0 }
 0x413   :  { %1757 = vmatmul.mubr.msk.f32.gmra.mrb[30].mxu0 %vm289_vm1, %v731_v45  ;;  %v1002_v45 = vld [vmem:[#allocation5 + $0x110] sm:$0xff] }
 0x4c9   :  { %v859_v12 = vpop.f32.mrb[16].mxu0 }
 0x4ca   :  { %v860_v39 = vadd.f32 %v859_v12, %v762_v23  ;;  %v2679_v28 = vpop.f32.mrb[17].mxu0 }
 0x4cc   :  { %v906_v58 = vmax.f32 %v860_v39, 0.0 }
 0x4cd   :  { %v865_v46 = vpop.f32.mrb[18].mxu0 }
 0x4ce   :  { %v866_v7 = vadd.f32 %v865_v46, %v762_v23  ;;  %v2681_v52 = vpop.f32.mrb[19].mxu0 }
 0x4d0   :  { %v907_v20 = vmax.f32 %v866_v7, 0.0 }
 0x4d1   :  { %v871_v59 = vpop.f32.mrb[20].mxu0 }
 0x4d2   :  { %v872_v53 = vadd.f32 %v871_v59, %v762_v23  ;;  %v2683_v0 = vpop.f32.mrb[21].mxu0  ;;  %v1031_v59 = vld [vmem:[#allocation5 + $0x198] sm:$0xff] }
 0x4d4   :  { %v908_v57 = vmax.f32 %v872_v53, 0.0 }
 0x4d5   :  { %v877_v40 = vpop.f32.mrb[22].mxu0 }
 0x4d6   :  { %v2685_v61 = vpop.f32.mrb[23].mxu0  ;;  %916 = vrot.lane.b32.xlu1 %v908_v57, %s2216_s4  ;;  %v878_v51 = vadd.f32 %v877_v40, %v762_v23 }
 0x4d8   :  { %v909_v47 = vmax.f32 %v878_v51, 0.0 }
 0x4da   :  { %v883_v36 = vpop.f32.mrb[24].mxu0 }
 0x4db   :  { %v884_v42 = vadd.f32 %v883_v36, %v762_v23  ;;  %v2688_v31 = vpop.f32.mrb[25].mxu0 }
 0x4dd   :  { %v910_v43 = vmax.f32 %v884_v42, 0.0 }
 0x4de   :  { %v889_v19 = vpop.f32.mrb[26].mxu0 }
 0x4df   :  { %v2690_v9 = vpop.f32.mrb[27].mxu0  ;;  %924 = vrot.lane.b32.xlu0 %v910_v43, %s2210_s19  ;;  %v890_v14 = vadd.f32 %v889_v19, %v762_v23 }
 0x4e1   :  { %v911_v10 = vmax.f32 %v890_v14, 0.0 }
 0x4e2   :  { %v895_v5 = vpop.f32.mrb[28].mxu0 }
 0x4e3   :  { %v896_v44 = vadd.f32 %v895_v5, %v762_v23  ;;  %918 = vrot.lane.b32.xlu0 %v909_v47, %s2216_s4  ;;  %v2694_v54 = vpop.f32.mrb[29].mxu0 }
 0x4e4   :  { %3065 = vst [vmem:[#allocation11_spill] sm:$0xff] %v2694_v54 }
 0x4e5   :  { %v912_v48 = vmax.f32 %v896_v44, 0.0 }
 0x4e6   :  { %v901_v18 = vpop.f32.mrb[30].mxu0 }
 0x4e7   :  { %v902_v1 = vadd.f32 %v901_v18, %v762_v23  ;;  %v2696_v25 = vpop.f32.mrb[31].mxu0  ;;  %932 = vrot.lane.b32.xlu1 %v912_v48, %s2219_s29  ;;  %v1030_v23 = vld [vmem:[#allocation5 + $0x118] sm:$0xff]  ;;  %v1058_v48 = vld [vmem:[#allocation5 + $0x120] sm:$0xff] }
 0x4e8   :  { %v1059_v18 = vld [vmem:[#allocation5 + $0x1a0] sm:$0xff] }
 0x4e9   :  { %v913_v22 = vmax.f32 %v902_v1, 0.0  ;;  %v1086_v1 = vld [vmem:[#allocation5 + $0x128] sm:$0xff] }
 0x4eb   :  { %934 = vrot.lane.b32.xlu0 %v913_v22, %s2219_s29  ;;  %926 = vrot.lane.b32.xlu1 %v911_v10, %s2210_s19 }
 0x548   :  { %v917_v33 = vpop.permute.xlu1 %916 }
 0x549   :  { %v938_v29 = vsel %vm289_vm1, %v906_v58, %v917_v33  ;;  %v1114_v58 = vld [vmem:[#allocation5 + $0x130] sm:$0xff] }
 0x551   :  { %v925_v13 = vpop.permute.xlu0 %924 }
 0x552   :  { %v940_v60 = vsel %vm293_vm3, %v938_v29, %v925_v13  ;;  %v1115_v29 = vld [vmem:[#allocation5 + $0x1b0] sm:$0xff] }
 0x555   :  { %v919_v21 = vpop.permute.xlu0 %918 }
 0x556   :  { %v939_v11 = vsel %vm289_vm1, %v907_v20, %v919_v21 }
 0x559   :  { %v933_v26 = vpop.permute.xlu1 %932 }
 0x55a   :  { %v942_v15 = vsel %vm297_vm5, %v940_v60, %v933_v26 }
 0x55b   :  { %v2705_v32 = vrot.slane %v942_v15, %v2375_v17  ;;  %v2709_v30 = vrot.slane %v942_v15, %v2420_v4  ;;  %v2712_v41 = vrot.slane %v942_v15, %v2408_v62  ;;  %v2715_v34 = vrot.slane %v942_v15, %v2411_v63 }
 0x55c   :  { %v2721_v12 = vrot.slane %v942_v15, %v2414_v2  ;;  %v2725_v53 = vrot.slane %v942_v15, %v2417_v3  ;;  %v2728_v57 = vrot.slane %v942_v15, %v2424_v6  ;;  %v2733_v42 = vrot.slane %v942_v15, %v2427_v8  ;;  %v1142_v15 = vld [vmem:[#allocation5 + $0x138] sm:$0xff] }
 0x55d   :  { %v935_v16 = vpop.permute.xlu0 %934  ;;  %v927_v38 = vpop.permute.xlu1 %926  ;;  %v958_v37 = vmul.f32 %v2705_v32, %v946_v24  ;;  %v959_v55 = vmul.f32 %v2705_v32, %v947_v35  ;;  %v986_v40 = vmul.f32 %v2709_v30, %v974_v56  ;;  %v987_v36 = vmul.f32 %v2709_v30, %v975_v49  ;;  %v1170_v24 = vld [vmem:[#allocation5 + $0x140] sm:$0xff]  ;;  %v1226_v49 = vld [vmem:[#allocation5 + $0x150] sm:$0xff] }
 0x55e   :  { %v941_v50 = vsel %vm293_vm3, %v939_v11, %v927_v38  ;;  %v1014_v51 = vmul.f32 %v2712_v41, %v1002_v45  ;;  %v1015_v43 = vmul.f32 %v2712_v41, %v1003_v27  ;;  %v1042_v19 = vmul.f32 %v2715_v34, %v1030_v23  ;;  %v1199_v38 = vld [vmem:[#allocation5 + $0x1c8] sm:$0xff]  ;;  %v1254_v45 = vld [vmem:[#allocation5 + $0x158] sm:$0xff] }
 0x55f   :  { %v943_v39 = vsel %vm297_vm5, %v941_v50, %v935_v16  ;;  %v966_v46 = vmax.f32 %v958_v37, 0.0  ;;  %v967_v7 = vmax.f32 %v959_v55, 0.0  ;;  %v1043_v14 = vmul.f32 %v2715_v34, %v1031_v59  ;;  %v1171_v16 = vld [vmem:[#allocation5 + $0x1c0] sm:$0xff]  ;;  %v1227_v50 = vld [vmem:[#allocation5 + $0x1d0] sm:$0xff]  ;;  %v972_v59 = vld [vmem:[#allocation5 + $0x8] sm:$0xff] }
 0x560   :  { %v2739_v47 = vrot.slane %v943_v39, %v2375_v17  ;;  %v2743_v10 = vrot.slane %v943_v39, %v2420_v4  ;;  %v2746_v22 = vrot.slane %v943_v39, %v2408_v62  ;;  %v2749_v13 = vrot.slane %v943_v39, %v2411_v63  ;;  %v1087_v17 = vld [vmem:[#allocation5 + $0x1a8] sm:$0xff]  ;;  %v1143_v62 = vld [vmem:[#allocation5 + $0x1b8] sm:$0xff] }
 0x561   :  { %v994_v5 = vmax.f32 %v966_v46, %v986_v40  ;;  %v995_v44 = vmax.f32 %v967_v7, %v987_v36  ;;  %v2752_v33 = vrot.slane %v943_v39, %v2414_v2  ;;  %v2755_v60 = vrot.slane %v943_v39, %v2417_v3  ;;  %v1198_v3 = vld [vmem:[#allocation5 + $0x148] sm:$0xff]  ;;  %v944_v46 = vld [vmem:[#allocation5] sm:$0xff] }
 0x562   :  { %v2758_v21 = vrot.slane %v943_v39, %v2424_v6  ;;  %v2761_v63 = vrot.slane %v943_v39, %v2427_v8  ;;  %v1070_v2 = vmul.f32 %v2721_v12, %v1058_v48  ;;  %v1071_v35 = vmul.f32 %v2721_v12, %v1059_v18  ;;  %v945_v7 = vld [vmem:[#allocation5 + $0x80] sm:$0xff] }
 0x563   :  { %v1022_v26 = vmax.f32 %v994_v5, %v1014_v51  ;;  %v1023_v20 = vmax.f32 %v995_v44, %v1015_v43  ;;  %v1098_v11 = vmul.f32 %v2725_v53, %v1086_v1  ;;  %v1099_v55 = vmul.f32 %v2725_v53, %v1087_v17  ;;  %v1282_v5 = vld [vmem:[#allocation5 + $0x160] sm:$0xff]  ;;  %v973_v44 = vld [vmem:[#allocation5 + $0x88] sm:$0xff]  ;;  %v1000_v17 = vld [vmem:[#allocation5 + $0x10] sm:$0xff] }
 0x564   :  { %v1126_v56 = vmul.f32 %v2728_v57, %v1114_v58  ;;  %v1127_v8 = vmul.f32 %v2728_v57, %v1115_v29  ;;  %v1154_v27 = vmul.f32 %v2733_v42, %v1142_v15  ;;  %v1155_v23 = vmul.f32 %v2733_v42, %v1143_v62 }
 0x565   :  { %v1050_v37 = vmax.f32 %v1022_v26, %v1042_v19  ;;  %v1051_v6 = vmax.f32 %v1023_v20, %v1043_v14  ;;  %v2772_v39 = vmul.f32 %v2739_v47, %v1170_v24  ;;  %v1183_v51 = vmul.f32 %v2739_v47, %v1171_v16  ;;  %v1255_v19 = vld [vmem:[#allocation5 + $0x1d8] sm:$0xff]  ;;  %v1283_v26 = vld [vmem:[#allocation5 + $0x1e0] sm:$0xff]  ;;  %v1310_v20 = vld [vmem:[#allocation5 + $0x168] sm:$0xff] }
 0x566   :  { %v1210_v43 = vmul.f32 %v2743_v10, %v1198_v3  ;;  %v1211_v14 = vmul.f32 %v2743_v10, %v1199_v38  ;;  %v2778_v48 = vmul.f32 %v2746_v22, %v1226_v49  ;;  %v2781_v18 = vmul.f32 %v2746_v22, %v1227_v50  ;;  %v1001_v24 = vld [vmem:[#allocation5 + $0x90] sm:$0xff]  ;;  %v1028_v38 = vld [vmem:[#allocation5 + $0x18] sm:$0xff] }
 0x567   :  { %v1078_v40 = vmax.f32 %v1050_v37, %v1070_v2  ;;  %v1079_v36 = vmax.f32 %v1051_v6, %v1071_v35  ;;  %v2784_v1 = vmul.f32 %v2749_v13, %v1254_v45  ;;  %v956_v15 = vmul.f32 %v2705_v32, %v944_v46  ;;  %v1311_v6 = vld [vmem:[#allocation5 + $0x1e8] sm:$0xff]  ;;  %v1029_v45 = vld [vmem:[#allocation5 + $0x98] sm:$0xff] }
 0x568   :  { %v957_v62 = vmul.f32 %v2705_v32, %v945_v7  ;;  %v2789_v2 = vmul.f32 %v2749_v13, %v1255_v19  ;;  %v2792_v35 = vmul.f32 %v2752_v33, %v1282_v5  ;;  %v984_v16 = vmul.f32 %v2709_v30, %v972_v59 }
 0x569   :  { %v1106_v58 = vmax.f32 %v1078_v40, %v1098_v11  ;;  %v1107_v29 = vmax.f32 %v1079_v36, %v1099_v55  ;;  %v985_v3 = vmul.f32 %v2709_v30, %v973_v44  ;;  %v1338_v55 = vld [vmem:[#allocation5 + $0x170] sm:$0xff]  ;;  %v964_v49 = vmax.f32 %v956_v15, 0.0  ;;  %v1056_v36 = vld [vmem:[#allocation5 + $0x20] sm:$0xff] }
 0x56a   :  { %v965_v50 = vmax.f32 %v957_v62, 0.0  ;;  %v2797_v46 = vmul.f32 %v2752_v33, %v1283_v26  ;;  %v2800_v7 = vmul.f32 %v2755_v60, %v1310_v20  ;;  %v1012_v40 = vmul.f32 %v2712_v41, %v1000_v17  ;;  %v1367_v20 = vld [vmem:[#allocation5 + $0x1f8] sm:$0xff] }
 0x56b   :  { %v1134_v11 = vmax.f32 %v1106_v58, %v1126_v56  ;;  %v1135_v37 = vmax.f32 %v1107_v29, %v1127_v8  ;;  %v1013_v59 = vmul.f32 %v2712_v41, %v1001_v24  ;;  %v1339_v56 = vld [vmem:[#allocation5 + $0x1f0] sm:$0xff]  ;;  %v1366_v8 = vld [vmem:[#allocation5 + $0x178] sm:$0xff]  ;;  %v992_v44 = vmax.f32 %v964_v49, %v984_v16  ;;  %v1057_v29 = vld [vmem:[#allocation5 + $0xa0] sm:$0xff] }
 0x56c   :  { %v993_v58 = vmax.f32 %v965_v50, %v985_v3  ;;  %v2805_v15 = vmul.f32 %v2755_v60, %v1311_v6  ;;  %v2808_v26 = vmul.f32 %v2758_v21, %v1338_v55  ;;  %v1040_v62 = vmul.f32 %v2715_v34, %v1028_v38  ;;  %v1085_v16 = vld [vmem:[#allocation5 + $0xa8] sm:$0xff]  ;;  %v1112_v3 = vld [vmem:[#allocation5 + $0x30] sm:$0xff] }
 0x56d   :  { %v1162_v19 = vmax.f32 %v1134_v11, %v1154_v27  ;;  %v1163_v5 = vmax.f32 %v1135_v37, %v1155_v23  ;;  %v1041_v17 = vmul.f32 %v2715_v34, %v1029_v45  ;;  %v1020_v23 = vmax.f32 %v992_v44, %v1012_v40  ;;  %v1084_v37 = vld [vmem:[#allocation5 + $0x28] sm:$0xff]  ;;  %v1113_v50 = vld [vmem:[#allocation5 + $0xb0] sm:$0xff]  ;;  %v1140_v40 = vld [vmem:[#allocation5 + $0x38] sm:$0xff] }
 0x56e   :  { %v1021_v11 = vmax.f32 %v993_v58, %v1013_v59  ;;  %v2814_v49 = vmul.f32 %v2758_v21, %v1339_v56  ;;  %v2817_v6 = vmul.f32 %v2761_v63, %v1366_v8  ;;  %v1068_v55 = vmul.f32 %v2721_v12, %v1056_v36  ;;  %v1141_v59 = vld [vmem:[#allocation5 + $0xb8] sm:$0xff]  ;;  %v1169_v58 = vld [vmem:[#allocation5 + $0xc0] sm:$0xff] }
 0x56f   :  { %v1190_v24 = vmax.f32 %v1162_v19, %v2772_v39  ;;  %v1191_v27 = vmax.f32 %v1163_v5, %v1183_v51  ;;  %v1069_v38 = vmul.f32 %v2721_v12, %v1057_v29  ;;  %v1048_v39 = vmax.f32 %v1020_v23, %v1040_v62  ;;  %v1168_v19 = vld [vmem:[#allocation5 + $0x40] sm:$0xff]  ;;  %v1196_v62 = vld [vmem:[#allocation5 + $0x48] sm:$0xff] }
 0x570   :  { %v1049_v51 = vmax.f32 %v1021_v11, %v1041_v17  ;;  %v1379_v5 = vmul.f32 %v2761_v63, %v1367_v20  ;;  %v1096_v56 = vmul.f32 %v2725_v53, %v1084_v37  ;;  %v1097_v44 = vmul.f32 %v2725_v53, %v1085_v16  ;;  %v1197_v17 = vld [vmem:[#allocation5 + $0xc8] sm:$0xff]  ;;  %v1225_v37 = vld [vmem:[#allocation5 + $0xd0] sm:$0xff] }
 0x571   :  { %v1218_v45 = vmax.f32 %v1190_v24, %v1210_v43  ;;  %v1219_v54 = vmax.f32 %v1191_v27, %v1211_v14  ;;  %v1124_v8 = vmul.f32 %v2728_v57, %v1112_v3  ;;  %v1076_v43 = vmax.f32 %v1048_v39, %v1068_v55  ;;  %v1224_v24 = vld [vmem:[#allocation5 + $0x50] sm:$0xff]  ;;  %v950_v55 = vld [vmem:[#allocation5 + $0x300] sm:$0xff] }
 0x572   :  { %v1077_v14 = vmax.f32 %v1049_v51, %v1069_v38  ;;  %v1125_v27 = vmul.f32 %v2728_v57, %v1113_v50  ;;  %v1152_v20 = vmul.f32 %v2733_v42, %v1140_v40  ;;  %v1153_v23 = vmul.f32 %v2733_v42, %v1141_v59  ;;  %v951_v38 = vld [vmem:[#allocation5 + $0x380] sm:$0xff] }
 0x573   :  { %v1246_v36 = vmax.f32 %v1218_v45, %v2778_v48  ;;  %v1247_v29 = vmax.f32 %v1219_v54, %v2781_v18  ;;  %v1180_v11 = vmul.f32 %v2739_v47, %v1168_v19  ;;  %v1104_v3 = vmax.f32 %v1076_v43, %v1096_v56  ;;  %v1252_v18 = vld [vmem:[#allocation5 + $0x58] sm:$0xff]  ;;  %v979_v56 = vld [vmem:[#allocation5 + $0x388] sm:$0xff] }
 0x574   :  { %v1105_v54 = vmax.f32 %v1077_v14, %v1097_v44  ;;  %v1181_v45 = vmul.f32 %v2739_v47, %v1169_v58  ;;  %v1208_v50 = vmul.f32 %v2743_v10, %v1196_v62  ;;  %v1209_v39 = vmul.f32 %v2743_v10, %v1197_v17  ;;  %v1006_v17 = vld [vmem:[#allocation5 + $0x310] sm:$0xff] }
 0x575   :  { %v1274_v16 = vmax.f32 %v1246_v36, %v2784_v1  ;;  %v1275_v48 = vmax.f32 %v1247_v29, %v2789_v2  ;;  %v1236_v51 = vmul.f32 %v2746_v22, %v1224_v24  ;;  %v1132_v1 = vmax.f32 %v1104_v3, %v1124_v8  ;;  %v978_v2 = vld [vmem:[#allocation5 + $0x308] sm:$0xff] }
 0x576   :  { %v1133_v19 = vmax.f32 %v1105_v54, %v1125_v27  ;;  %v1237_v44 = vmul.f32 %v2746_v22, %v1225_v37  ;;  %v1264_v36 = vmul.f32 %v2749_v13, %v1252_v18  ;;  %v962_v58 = vmul.f32 %v2705_v32, %v950_v55  ;;  %v1034_v18 = vld [vmem:[#allocation5 + $0x318] sm:$0xff] }
 0x577   :  { %v1302_v40 = vmax.f32 %v1274_v16, %v2792_v35  ;;  %v1303_v59 = vmax.f32 %v1275_v48, %v2797_v46  ;;  %v963_v29 = vmul.f32 %v2705_v32, %v951_v38  ;;  %v1160_v62 = vmax.f32 %v1132_v1, %v1152_v20  ;;  %v1007_v46 = vld [vmem:[#allocation5 + $0x390] sm:$0xff]  ;;  %v1253_v55 = vld [vmem:[#allocation5 + $0xd8] sm:$0xff] }
 0x578   :  { %v1161_v35 = vmax.f32 %v1133_v19, %v1153_v23  ;;  %v970_v8 = vmax.f32 %v962_v58, 0.0  ;;  %v990_v27 = vmul.f32 %v2709_v30, %v978_v2  ;;  %v991_v37 = vmul.f32 %v2709_v30, %v979_v56  ;;  %v1062_v19 = vld [vmem:[#allocation5 + $0x320] sm:$0xff] }
 0x579   :  { %v1330_v43 = vmax.f32 %v1302_v40, %v2800_v7  ;;  %v1331_v14 = vmax.f32 %v1303_v59, %v2805_v15  ;;  %v971_v24 = vmax.f32 %v963_v29, 0.0  ;;  %v1188_v3 = vmax.f32 %v1160_v62, %v1180_v11  ;;  %v1035_v7 = vld [vmem:[#allocation5 + $0x398] sm:$0xff]  ;;  %v1280_v11 = vld [vmem:[#allocation5 + $0x60] sm:$0xff]  ;;  %v1090_v62 = vld [vmem:[#allocation5 + $0x328] sm:$0xff] }
 0x57a   :  { %v1189_v54 = vmax.f32 %v1161_v35, %v1181_v45  ;;  %v998_v15 = vmax.f32 %v970_v8, %v990_v27  ;;  %v1018_v23 = vmul.f32 %v2712_v41, %v1006_v17  ;;  %v1019_v38 = vmul.f32 %v2712_v41, %v1007_v46  ;;  %v1281_v45 = vld [vmem:[#allocation5 + $0xe0] sm:$0xff]  ;;  %v1309_v35 = vld [vmem:[#allocation5 + $0xe8] sm:$0xff] }
 0x57b   :  { %v1358_v16 = vmax.f32 %v1330_v43, %v2808_v26  ;;  %v1359_v48 = vmax.f32 %v1331_v14, %v2814_v49  ;;  %v999_v20 = vmax.f32 %v971_v24, %v991_v37  ;;  %v1216_v1 = vmax.f32 %v1188_v3, %v1208_v50  ;;  %v1063_v49 = vld [vmem:[#allocation5 + $0x3a0] sm:$0xff]  ;;  %v1091_v50 = vld [vmem:[#allocation5 + $0x3a8] sm:$0xff]  ;;  %v1336_v3 = vld [vmem:[#allocation5 + $0x70] sm:$0xff] }
 0x57c   :  { %v1217_v26 = vmax.f32 %v1189_v54, %v1209_v39  ;;  %v1026_v2 = vmax.f32 %v998_v15, %v1018_v23  ;;  %v1046_v58 = vmul.f32 %v2715_v34, %v1034_v18  ;;  %v1047_v29 = vmul.f32 %v2715_v34, %v1035_v7  ;;  %v1308_v39 = vld [vmem:[#allocation5 + $0x68] sm:$0xff]  ;;  %v1337_v54 = vld [vmem:[#allocation5 + $0xf0] sm:$0xff] }
 0x57d   :  { %v2852_v40 = vmax.f32 %v1358_v16, %v2817_v6  ;;  %v2854_v59 = vmax.f32 %v1359_v48, %v1379_v5  ;;  %v1027_v56 = vmax.f32 %v999_v20, %v1019_v38  ;;  %v1244_v14 = vmax.f32 %v1216_v1, %v1236_v51  ;;  %v1119_v48 = vld [vmem:[#allocation5 + $0x3b0] sm:$0xff]  ;;  %v1146_v1 = vld [vmem:[#allocation5 + $0x338] sm:$0xff] }
 0x57e   :  { %v1245_v6 = vmax.f32 %v1217_v26, %v1237_v44  ;;  %v1265_v5 = vmul.f32 %v2749_v13, %v1253_v55  ;;  %v1054_v17 = vmax.f32 %v1026_v2, %v1046_v58  ;;  %v1074_v8 = vmul.f32 %v2721_v12, %v1062_v19  ;;  %v1118_v44 = vld [vmem:[#allocation5 + $0x330] sm:$0xff]  ;;  %v1147_v26 = vld [vmem:[#allocation5 + $0x3b8] sm:$0xff] }
 0x57f   :  { %v2100_v43 = vpack.i.bf16 %v2854_v59, %v2852_v40  ;;  %v1055_v46 = vmax.f32 %v1027_v56, %v1047_v29  ;;  %v1075_v24 = vmul.f32 %v2721_v12, %v1063_v49  ;;  %v1272_v27 = vmax.f32 %v1244_v14, %v1264_v36  ;;  %v1364_v19 = vld [vmem:[#allocation5 + $0x78] sm:$0xff] }
 0x580   :  { %v1273_v37 = vmax.f32 %v1245_v6, %v1265_v5  ;;  %v1292_v16 = vmul.f32 %v2752_v33, %v1280_v11  ;;  %v1293_v51 = vmul.f32 %v2752_v33, %v1281_v45  ;;  %v1082_v18 = vmax.f32 %v1054_v17, %v1074_v8  ;;  %v1365_v49 = vld [vmem:[#allocation5 + $0xf8] sm:$0xff]  ;;  %v1174_v6 = vld [vmem:[#allocation5 + $0x340] sm:$0xff] }
 0x581   :  { %2101 = vrot.lane.b32.xlu0 %v2100_v43, %s2210_s19  ;;  %v1083_v7 = vmax.f32 %v1055_v46, %v1075_v24  ;;  %v1102_v55 = vmul.f32 %v2725_v53, %v1090_v62  ;;  %v1103_v15 = vmul.f32 %v2725_v53, %v1091_v50  ;;  %v1320_v38 = vmul.f32 %v2755_v60, %v1308_v39  ;;  %v1175_v5 = vld [vmem:[#allocation5 + $0x3c0] sm:$0xff] }
 0x582   :  { %v1300_v20 = vmax.f32 %v1272_v27, %v1292_v16  ;;  %v1301_v23 = vmax.f32 %v1273_v37, %v1293_v51  ;;  %v1321_v36 = vmul.f32 %v2755_v60, %v1309_v35  ;;  %v1130_v2 = vmul.f32 %v2728_v57, %v1118_v44  ;;  %v1202_v27 = vld [vmem:[#allocation5 + $0x348] sm:$0xff] }
 0x583   :  { %v1110_v11 = vmax.f32 %v1082_v18, %v1102_v55  ;;  %v1111_v45 = vmax.f32 %v1083_v7, %v1103_v15  ;;  %v1131_v56 = vmul.f32 %v2728_v57, %v1119_v48  ;;  %v1348_v43 = vmul.f32 %v2758_v21, %v1336_v3  ;;  %v1203_v37 = vld [vmem:[#allocation5 + $0x3c8] sm:$0xff]  ;;  %v948_v3 = vld [vmem:[#allocation5 + $0x200] sm:$0xff]  ;;  %v1230_v55 = vld [vmem:[#allocation5 + $0x350] sm:$0xff] }
 0x584   :  { %v1328_v58 = vmax.f32 %v1300_v20, %v1320_v38  ;;  %v1329_v29 = vmax.f32 %v1301_v23, %v1321_v36  ;;  %v1349_v14 = vmul.f32 %v2758_v21, %v1337_v54  ;;  %v1158_v39 = vmul.f32 %v2733_v42, %v1146_v1  ;;  %v949_v54 = vld [vmem:[#allocation5 + $0x280] sm:$0xff]  ;;  %v1231_v15 = vld [vmem:[#allocation5 + $0x3d0] sm:$0xff]  ;;  %v976_v1 = vld [vmem:[#allocation5 + $0x208] sm:$0xff] }
 0x585   :  { %v1138_v62 = vmax.f32 %v1110_v11, %v1130_v2  ;;  %v1139_v50 = vmax.f32 %v1111_v45, %v1131_v56  ;;  %v1159_v35 = vmul.f32 %v2733_v42, %v1147_v26  ;;  %v1376_v8 = vmul.f32 %v2761_v63, %v1364_v19  ;;  %v977_v26 = vld [vmem:[#allocation5 + $0x288] sm:$0xff]  ;;  %v1259_v11 = vld [vmem:[#allocation5 + $0x3d8] sm:$0xff] }
 0x586   :  { %v1356_v17 = vmax.f32 %v1328_v58, %v1348_v43  ;;  %v1357_v46 = vmax.f32 %v1329_v29, %v1349_v14  ;;  %v1377_v24 = vmul.f32 %v2761_v63, %v1365_v49  ;;  %v1186_v44 = vmul.f32 %v2739_v47, %v1174_v6  ;;  %v1258_v49 = vld [vmem:[#allocation5 + $0x358] sm:$0xff]  ;;  %v1004_v14 = vld [vmem:[#allocation5 + $0x210] sm:$0xff] }
 0x587   :  { %v1166_v16 = vmax.f32 %v1138_v62, %v1158_v39  ;;  %v1167_v51 = vmax.f32 %v1139_v50, %v1159_v35  ;;  %v1187_v48 = vmul.f32 %v2739_v47, %v1175_v5  ;;  %v1214_v38 = vmul.f32 %v2743_v10, %v1202_v27  ;;  %v1005_v6 = vld [vmem:[#allocation5 + $0x290] sm:$0xff]  ;;  %v1286_v5 = vld [vmem:[#allocation5 + $0x360] sm:$0xff]  ;;  %v1032_v27 = vld [vmem:[#allocation5 + $0x218] sm:$0xff] }
 0x588   :  { %v2880_v18 = vmax.f32 %v1356_v17, %v1376_v8  ;;  %v2882_v7 = vmax.f32 %v1357_v46, %v1377_v24  ;;  %v1215_v36 = vmul.f32 %v2743_v10, %v1203_v37  ;;  %v960_v45 = vmul.f32 %v2705_v32, %v948_v3  ;;  %v1287_v62 = vld [vmem:[#allocation5 + $0x3e0] sm:$0xff]  ;;  %v1033_v37 = vld [vmem:[#allocation5 + $0x298] sm:$0xff] }
 0x589   :  { %v1194_v20 = vmax.f32 %v1166_v16, %v1186_v44  ;;  %v1195_v23 = vmax.f32 %v1167_v51, %v1187_v48  ;;  %v961_v2 = vmul.f32 %v2705_v32, %v949_v54  ;;  %v1242_v29 = vmul.f32 %v2746_v22, %v1230_v55  ;;  %v1314_v16 = vld [vmem:[#allocation5 + $0x368] sm:$0xff] }
 0x58a   :  { %v2095_v19 = vpack.i.bf16 %v2882_v7, %v2880_v18  ;;  %v1243_v43 = vmul.f32 %v2746_v22, %v1231_v15  ;;  %v968_v50 = vmax.f32 %v960_v45, 0.0  ;;  %v988_v35 = vmul.f32 %v2709_v30, %v976_v1  ;;  %v1315_v51 = vld [vmem:[#allocation5 + $0x3e8] sm:$0xff]  ;;  %v1343_v1 = vld [vmem:[#allocation5 + $0x3f0] sm:$0xff] }
 0x58b   :  { %v1222_v56 = vmax.f32 %v1194_v20, %v1214_v38  ;;  %v1223_v58 = vmax.f32 %v1195_v23, %v1215_v36  ;;  %v969_v39 = vmax.f32 %v961_v2, 0.0  ;;  %v989_v17 = vmul.f32 %v2709_v30, %v977_v26  ;;  %v1060_v23 = vld [vmem:[#allocation5 + $0x220] sm:$0xff]  ;;  %v1342_v36 = vld [vmem:[#allocation5 + $0x370] sm:$0xff] }
 0x58c   :  { %2096 = vrot.lane.b32.xlu1 %v2095_v19, %s2210_s19  ;;  %v1270_v8 = vmul.f32 %v2749_v13, %v1258_v49  ;;  %v1271_v24 = vmul.f32 %v2749_v13, %v1259_v11  ;;  %v996_v44 = vmax.f32 %v968_v50, %v988_v35  ;;  %v1016_v3 = vmul.f32 %v2712_v41, %v1004_v14  ;;  %v1061_v38 = vld [vmem:[#allocation5 + $0x2a0] sm:$0xff]  ;;  %v1371_v14 = vld [vmem:[#allocation5 + $0x3f8] sm:$0xff] }
 0x58d   :  { %v1250_v46 = vmax.f32 %v1222_v56, %v1242_v29  ;;  %v1251_v32 = vmax.f32 %v1223_v58, %v1243_v43  ;;  %v997_v48 = vmax.f32 %v969_v39, %v989_v17  ;;  %v1017_v54 = vmul.f32 %v2712_v41, %v1005_v6  ;;  %v1088_v58 = vld [vmem:[#allocation5 + $0x228] sm:$0xff]  ;;  %v1370_v43 = vld [vmem:[#allocation5 + $0x378] sm:$0xff] }
 0x58e   :  { %v1298_v30 = vmul.f32 %v2752_v33, %v1286_v5  ;;  %v1299_v20 = vmul.f32 %v2752_v33, %v1287_v62  ;;  %v1024_v26 = vmax.f32 %v996_v44, %v1016_v3  ;;  %v1044_v49 = vmul.f32 %v2715_v34, %v1032_v27  ;;  %v1089_v29 = vld [vmem:[#allocation5 + $0x2a8] sm:$0xff]  ;;  %v1145_v3 = vld [vmem:[#allocation5 + $0x2b8] sm:$0xff] }
 0x58f   :  { %v1278_v55 = vmax.f32 %v1250_v46, %v1270_v8  ;;  %v1279_v15 = vmax.f32 %v1251_v32, %v1271_v24  ;;  %v1025_v19 = vmax.f32 %v997_v48, %v1017_v54  ;;  %v1045_v11 = vmul.f32 %v2715_v34, %v1033_v37  ;;  %v1116_v46 = vld [vmem:[#allocation5 + $0x230] sm:$0xff]  ;;  %v1144_v48 = vld [vmem:[#allocation5 + $0x238] sm:$0xff] }
 0x590   :  { %v1326_v41 = vmul.f32 %v2755_v60, %v1314_v16  ;;  %v1327_v56 = vmul.f32 %v2755_v60, %v1315_v51  ;;  %v1052_v6 = vmax.f32 %v1024_v26, %v1044_v49  ;;  %v1072_v62 = vmul.f32 %v2721_v12, %v1060_v23  ;;  %v1117_v32 = vld [vmem:[#allocation5 + $0x2b0] sm:$0xff] }
 0x591   :  { %v1306_v45 = vmax.f32 %v1278_v55, %v1298_v30  ;;  %v1307_v2 = vmax.f32 %v1279_v15, %v1299_v20  ;;  %v1053_v5 = vmax.f32 %v1025_v19, %v1045_v11  ;;  %v1073_v50 = vmul.f32 %v2721_v12, %v1061_v38  ;;  %v1172_v38 = vld [vmem:[#allocation5 + $0x240] sm:$0xff]  ;;  %v1200_v11 = vld [vmem:[#allocation5 + $0x248] sm:$0xff] }
 0x592   :  { %v1354_v34 = vmul.f32 %v2758_v21, %v1342_v36  ;;  %v1355_v17 = vmul.f32 %v2758_v21, %v1343_v1  ;;  %v1080_v8 = vmax.f32 %v1052_v6, %v1072_v62  ;;  %v1100_v27 = vmul.f32 %v2725_v53, %v1088_v58  ;;  %v1228_v58 = vld [vmem:[#allocation5 + $0x250] sm:$0xff]  ;;  %v1257_v62 = vld [vmem:[#allocation5 + $0x2d8] sm:$0xff] }
 0x593   :  { %v1334_v39 = vmax.f32 %v1306_v45, %v1326_v41  ;;  %v1335_v35 = vmax.f32 %v1307_v2, %v1327_v56  ;;  %v1081_v24 = vmax.f32 %v1053_v5, %v1073_v50  ;;  %v1101_v37 = vmul.f32 %v2725_v53, %v1089_v29  ;;  %v1173_v53 = vld [vmem:[#allocation5 + $0x2c0] sm:$0xff]  ;;  %v1201_v45 = vld [vmem:[#allocation5 + $0x2c8] sm:$0xff]  ;;  %v1229_v29 = vld [vmem:[#allocation5 + $0x2d0] sm:$0xff] }
 0x594   :  { %v1382_v44 = vmul.f32 %v2761_v63, %v1370_v43  ;;  %v1383_v12 = vmul.f32 %v2761_v63, %v1371_v14  ;;  %v1108_v54 = vmax.f32 %v1080_v8, %v1100_v27  ;;  %v1128_v15 = vmul.f32 %v2728_v57, %v1116_v46  ;;  %v1256_v5 = vld [vmem:[#allocation5 + $0x258] sm:$0xff]  ;;  %v1312_v27 = vld [vmem:[#allocation5 + $0x268] sm:$0xff] }
 0x595   :  { %v1362_v16 = vmax.f32 %v1334_v39, %v1354_v34  ;;  %v1363_v51 = vmax.f32 %v1335_v35, %v1355_v17  ;;  %v1109_v55 = vmax.f32 %v1081_v24, %v1101_v37  ;;  %v1129_v30 = vmul.f32 %v2728_v57, %v1117_v32  ;;  %v1284_v17 = vld [vmem:[#allocation5 + $0x260] sm:$0xff]  ;;  %v1313_v37 = vld [vmem:[#allocation5 + $0x2e8] sm:$0xff] }
 0x596   :  { %v1136_v36 = vmax.f32 %v1108_v54, %v1128_v15  ;;  %v1156_v26 = vmul.f32 %v2733_v42, %v1144_v48  ;;  %v1157_v19 = vmul.f32 %v2733_v42, %v1145_v3  ;;  %v1184_v57 = vmul.f32 %v2739_v47, %v1172_v38  ;;  %v1341_v48 = vld [vmem:[#allocation5 + $0x2f0] sm:$0xff]  ;;  %v1368_v15 = vld [vmem:[#allocation5 + $0x278] sm:$0xff] }
 0x597   :  { %v2915_v20 = vmax.f32 %v1362_v16, %v1382_v44  ;;  %v2917_v23 = vmax.f32 %v1363_v51, %v1383_v12  ;;  %v1137_v1 = vmax.f32 %v1109_v55, %v1129_v30  ;;  %v1185_v56 = vmul.f32 %v2739_v47, %v1173_v53  ;;  %v1285_v47 = vld [vmem:[#allocation5 + $0x2e0] sm:$0xff]  ;;  %v1340_v12 = vld [vmem:[#allocation5 + $0x270] sm:$0xff]  ;;  %v1369_v30 = vld [vmem:[#allocation5 + $0x2f8] sm:$0xff] }
 0x598   :  { %v1164_v2 = vmax.f32 %v1136_v36, %v1156_v26  ;;  %v1212_v6 = vmul.f32 %v2743_v10, %v1200_v11  ;;  %v1213_v42 = vmul.f32 %v2743_v10, %v1201_v45  ;;  %v1240_v35 = vmul.f32 %v2746_v22, %v1228_v58  ;;  %v742_v26 = vld [vmem:[%s3060_s9 + $0x8] sm:$0xff] }
 0x599   :  { %v2110_v49 = vpack.i.bf16 %v2917_v23, %v2915_v20  ;;  %v1165_v41 = vmax.f32 %v1137_v1, %v1157_v19  ;;  %v1241_v34 = vmul.f32 %v2746_v22, %v1229_v29  ;;  %v1268_v8 = vmul.f32 %v2749_v13, %v1256_v5  ;;  %v750_v5 = vld [vmem:[%s3060_s9 + $0x48] sm:$0xff] }
 0x59a   :  { %v1192_v43 = vmax.f32 %v1164_v2, %v1184_v57  ;;  %v1269_v24 = vmul.f32 %v2749_v13, %v1257_v62  ;;  %v1296_v51 = vmul.f32 %v2752_v33, %v1284_v17  ;;  %v1297_v44 = vmul.f32 %v2752_v33, %v1285_v47  ;;  %v741_v33 = vld [vmem:[%s3060_s9] sm:$0xff]  ;;  %v746_v57 = vld [vmem:[%s3060_s9 + $0x28] sm:$0xff] }
 0x59b   :  { %2111 = vrot.lane.b32.xlu0 %v2110_v49, %s2210_s19  ;;  %v1193_v14 = vmax.f32 %v1165_v41, %v1185_v56  ;;  %v1324_v54 = vmul.f32 %v2755_v60, %v1312_v27  ;;  %v1325_v55 = vmul.f32 %v2755_v60, %v1313_v37  ;;  %v1352_v53 = vmul.f32 %v2758_v21, %v1340_v12  ;;  %v743_v60 = vld [vmem:[%s3060_s9 + $0x10] sm:$0xff]  ;;  %v745_v41 = vld [vmem:[%s3060_s9 + $0x20] sm:$0xff]  ;;  %v754_v17 = vld [vmem:[%s3060_s9 + $0x68] sm:$0xff] }
 0x59c   :  { %v1220_v50 = vmax.f32 %v1192_v43, %v1212_v6  ;;  %v1353_v36 = vmul.f32 %v2758_v21, %v1341_v48  ;;  %v1380_v1 = vmul.f32 %v2761_v63, %v1368_v15  ;;  %v1381_v11 = vmul.f32 %v2761_v63, %v1369_v30  ;;  %v744_v21 = vld [vmem:[%s3060_s9 + $0x18] sm:$0xff]  ;;  %v747_v43 = vld [vmem:[%s3060_s9 + $0x30] sm:$0xff] }
 0x59d   :  { %v1221_v39 = vmax.f32 %v1193_v14, %v1213_v42  ;;  %v1980_v45 = vpack.c.bf16 %v742_v26, %v741_v33  ;;  %v1984_v2 = vpack.c.bf16 %v744_v21, %v743_v60  ;;  %v1988_v63 = vpack.c.bf16 %v746_v57, %v745_v41  ;;  %v748_v14 = vld [vmem:[%s3060_s9 + $0x38] sm:$0xff]  ;;  %v749_v42 = vld [vmem:[%s3060_s9 + $0x40] sm:$0xff]  ;;  %v1576_v33 = vld [vmem:[%s3062_s11 + $0x8] sm:$0xff] }
 0x59e   :  { %v1248_v46 = vmax.f32 %v1220_v50, %v1240_v35  ;;  %v1992_v6 = vpack.c.bf16 %v748_v14, %v747_v43  ;;  %v1996_v62 = vpack.c.bf16 %v750_v5, %v749_v42  ;;  %v751_v50 = vld [vmem:[%s3060_s9 + $0x50] sm:$0xff]  ;;  %v1578_v26 = vld [vmem:[%s3062_s11 + $0x18] sm:$0xff] }
 0x59f   :  { %v1249_v32 = vmax.f32 %v1221_v39, %v1241_v34  ;;  %1981 = vmatprep.subr.bf16.mxu1 %v1980_v45  ;;  %v752_v39 = vld [vmem:[%s3060_s9 + $0x58] sm:$0xff]  ;;  %v753_v34 = vld [vmem:[%s3060_s9 + $0x60] sm:$0xff] }
 0x5a0   :  { %v1276_v16 = vmax.f32 %v1248_v46, %v1268_v8  ;;  %1983 = vmatpush3.bf16.msra.mxu1 %v1980_v45  ;;  %v2000_v35 = vpack.c.bf16 %v752_v39, %v751_v50  ;;  %v2004_v47 = vpack.c.bf16 %v754_v17, %v753_v34  ;;  %v2135_v34 = vld [vmem:[%s3059_s8] sm:$0x3] }
 0x5a1   :  { %v1277_v10 = vmax.f32 %v1249_v32, %v1269_v24  ;;  %1985 = vmatprep.subr.bf16.mxu1 %v1984_v2  ;;  %v766_v17 = vrot.slane %v2135_v34, %v2420_v4 }
 0x5a2   :  { %v1304_v3 = vmax.f32 %v1276_v16, %v1296_v51  ;;  %v755_v16 = vld [vmem:[%s3060_s9 + $0x70] sm:$0xff] }
 0x5a3   :  { %v1305_v22 = vmax.f32 %v1277_v10, %v1297_v44  ;;  %v756_v10 = vld [vmem:[%s3060_s9 + $0x78] sm:$0xff] }
 0x5a4   :  { %v1332_v38 = vmax.f32 %v1304_v3, %v1324_v54  ;;  %1987 = vmatpush3.bf16.msra.mxu1 %v1984_v2  ;;  %v2008_v51 = vpack.c.bf16 %v756_v10, %v755_v16  ;;  %v880_v16 = vadd.f32 %v2685_v61, %v766_v17  ;;  %v886_v61 = vadd.f32 %v2688_v31, %v766_v17 }
 0x5a5   :  { %v1333_v13 = vmax.f32 %v1305_v22, %v1325_v55  ;;  %1989 = vmatprep.subr.bf16.mxu1 %v1988_v63 }
 0x5a6   :  { %v1360_v19 = vmax.f32 %v1332_v38, %v1352_v53 }
 0x5a7   :  { %v1361_v49 = vmax.f32 %v1333_v13, %v1353_v36 }
 0x5a8   :  { %v1388_v56 = vmax.f32 %v1360_v19, %v1380_v1  ;;  %1991 = vmatpush3.bf16.msra.mxu1 %v1988_v63 }
 0x5a9   :  { %v1389_v58 = vmax.f32 %v1361_v49, %v1381_v11  ;;  %1993 = vmatprep.subr.bf16.mxu1 %v1992_v6 }
 0x5ab   :  { %v2105_v29 = vpack.i.bf16 %v1389_v58, %v1388_v56 }
 0x5ac   :  { %1995 = vmatpush3.bf16.msra.mxu1 %v1992_v6 }
 0x5ad   :  { %2106 = vrot.lane.b32.xlu1 %v2105_v29, %s2210_s19  ;;  %1997 = vmatprep.subr.bf16.mxu1 %v1996_v62 }
 0x5b0   :  { %1999 = vmatpush3.bf16.msra.mxu1 %v1996_v62 }
 0x5b1   :  { %2001 = vmatprep.subr.bf16.mxu1 %v2000_v35 }
 0x5b4   :  { %2003 = vmatpush3.bf16.msra.mxu1 %v2000_v35 }
 0x5b5   :  { %2005 = vmatprep.subr.bf16.mxu1 %v2004_v47 }
 0x5b8   :  { %2007 = vmatpush3.bf16.msra.mxu1 %v2004_v47  ;;  %v868_v47 = vadd.f32 %v2681_v52, %v766_v17 }
 0x5b9   :  { %2009 = vmatprep.subr.bf16.mxu1 %v2008_v51 }
 0x5bc   :  { %2011 = vmatpush3.bf16.msra.mxu1 %v2008_v51  ;;  %v874_v51 = vadd.f32 %v2683_v0, %v766_v17  ;;  %v892_v0 = vadd.f32 %v2690_v9, %v766_v17 }
 0x5f3   :  { %v2102_v46 = vpop.permute.xlu0 %2101 }
 0x5f4   :  { %v2104_v32 = vunpack.i.h.bf16 %v2102_v46  ;;  %v2103_v8 = vunpack.i.l.bf16 %v2102_v46  ;;  %v862_v46 = vadd.f32 %v2679_v28, %v766_v17 }
 0x5f6   :  { %v1411_v24 = vmax.f32 %v2854_v59, %v2104_v32  ;;  %v1410_v27 = vmax.f32 %v2852_v40, %v2103_v8  ;;  %v1758_v32 = vld [vmem:[%s3061_s10] ss:$0 sm:$0xff] }
 0x5f8   :  { %v2120_v37 = vpack.i.bf16 %v1411_v24, %v1410_v27 }
 0x5fa   :  { %2121 = vrot.lane.b32.xlu0 %v2120_v37, %s2216_s4 }
 0x5fe   :  { %v2097_v44 = vpop.permute.xlu1 %2096 }
 0x5ff   :  { %v2099_v12 = vunpack.i.h.bf16 %v2097_v44  ;;  %v2098_v48 = vunpack.i.l.bf16 %v2097_v44 }
 0x601   :  { %v1409_v59 = vmax.f32 %v2882_v7, %v2099_v12  ;;  %v1408_v40 = vmax.f32 %v2880_v18, %v2098_v48  ;;  %v1575_v18 = vld [vmem:[%s3062_s11] sm:$0xff] }
 0x603   :  { %v2115_v3 = vpack.i.bf16 %v1409_v59, %v1408_v40 }
 0x605   :  { %2116 = vrot.lane.b32.xlu1 %v2115_v3, %s2216_s4 }
 0x60d   :  { %v2112_v22 = vpop.permute.xlu0 %2111 }
 0x60e   :  { %v2114_v54 = vunpack.i.h.bf16 %v2112_v22  ;;  %v2113_v55 = vunpack.i.l.bf16 %v2112_v22 }
 0x610   :  { %v1415_v15 = vmax.f32 %v2917_v23, %v2114_v54  ;;  %v1414_v30 = vmax.f32 %v2915_v20, %v2113_v55  ;;  %v1577_v20 = vld [vmem:[%s3062_s11 + $0x10] sm:$0xff]  ;;  %v2012_v23 = vpack.c.bf16 %v1576_v33, %v1575_v18 }
 0x611   :  { %v2016_v19 = vpack.c.bf16 %v1578_v26, %v1577_v20 }
 0x612   :  { %v2130_v38 = vpack.i.bf16 %v1415_v15, %v1414_v30  ;;  %2013 = vmatprep.subr.bf16.mxu0 %v2012_v23 }
 0x613   :  { %2015 = vmatpush3.bf16.msra.mxu0 %v2012_v23 }
 0x614   :  { %2131 = vrot.lane.b32.xlu0 %v2130_v38, %s2216_s4  ;;  %2017 = vmatprep.subr.bf16.mxu0 %v2016_v19 }
 0x617   :  { %2019 = vmatpush3.bf16.msra.mxu0 %v2016_v19 }
 0x61f   :  { %v2107_v13 = vpop.permute.xlu1 %2106 }
 0x620   :  { %v2109_v53 = vunpack.i.h.bf16 %v2107_v13  ;;  %v2108_v36 = vunpack.i.l.bf16 %v2107_v13  ;;  %v904_v13 = vadd.f32 %v2696_v25, %v766_v17  ;;  %v1759_v25 = vld [vmem:[%s3063_s12] ss:$0 sm:$0xff]  ;;  %s2180_s12 = scalar_lea.vmem %s1729_s0, 1024 }
 0x621   :  { %p2181_p2 = scmp.ne.s32.totalorder %s1729_s0, %s2180_s12  ;;  %p2186_p4 = scmp.lt.s32.totalorder %s2180_s12, %s2180_s12 }
 0x622   :  { %v1413_v1 = vmax.f32 %v1389_v58, %v2109_v53  ;;  %v1412_v7 = vmax.f32 %v1388_v56, %v2108_v36  ;;  %v3066_v36 = vld [vmem:[#allocation11_spill] sm:$0xff] }
 0x623   :  { %p2187_p5 = por %p2186_p4, %p2185_p3 }
 0x624   :  { %v2125_v60 = vpack.i.bf16 %v1413_v1, %v1412_v7 }
 0x625   :  { %p2188_p6 = pnand %p2187_p5, %p2181_p2 }
 0x626   :  { %2126 = vrot.lane.b32.xlu1 %v2125_v60, %s2216_s4 }
 0x66c   :  { %v2122_v49 = vpop.permute.xlu0 %2121 }
 0x66d   :  { %v2123_v45 = vunpack.i.l.bf16 %v2122_v49  ;;  %v2124_v56 = vunpack.i.h.bf16 %v2122_v49 }
 0x66f   :  { %v1434_v58 = vmax.f32 %v1410_v27, %v2123_v45  ;;  %v1435_v29 = vmax.f32 %v1411_v24, %v2124_v56 }
 0x677   :  { %v2117_v11 = vpop.permute.xlu1 %2116 }
 0x678   :  { %v2119_v21 = vunpack.i.h.bf16 %v2117_v11  ;;  %v2118_v2 = vunpack.i.l.bf16 %v2117_v11 }
 0x67a   :  { %v1433_v41 = vmax.f32 %v1409_v59, %v2119_v21  ;;  %v1432_v57 = vmax.f32 %v1408_v40, %v2118_v2 }
 0x67c   :  { %1904 = vmatprep.mubr.f32.mxu1 %v1432_v57 }
 0x67d   :  { %1905 = vmatmul.mubr.f32.vlgmr.msra.gmra.mrb[8].mxu1 %v1433_v41 }
 0x67e   :  { %1907 = vmatprep.mubr.f32.mxu1 %v1434_v58 }
 0x681   :  { %1908 = vmatmul.mubr.f32.gmra.mrb[10].mxu1 %v1435_v29 }
 0x686   :  { %v2132_v63 = vpop.permute.xlu0 %2131 }
 0x687   :  { %v2133_v14 = vunpack.i.l.bf16 %v2132_v63  ;;  %v2134_v62 = vunpack.i.h.bf16 %v2132_v63 }
 0x689   :  { %v1438_v39 = vmax.f32 %v1414_v30, %v2133_v14  ;;  %v1439_v35 = vmax.f32 %v1415_v15, %v2134_v62 }
 0x698   :  { %v2127_v43 = vpop.permute.xlu1 %2126 }
 0x699   :  { %v2129_v6 = vunpack.i.h.bf16 %v2127_v43  ;;  %v2128_v42 = vunpack.i.l.bf16 %v2127_v43 }
 0x69b   :  { %v1436_v5 = vmax.f32 %v1412_v7, %v2128_v42  ;;  %v1437_v50 = vmax.f32 %v1413_v1, %v2129_v6  ;;  %v898_v1 = vadd.f32 %v3066_v36, %v766_v17 }
 0x69d   :  { %1910 = vmatprep.mubr.f32.mxu1 %v1436_v5 }
 0x69e   :  { %1911 = vmatmul.mubr.f32.gmra.mrb[12].mxu1 %v1437_v50 }
 0x69f   :  { %1913 = vmatprep.mubr.f32.mxu1 %v1438_v39 }
 0x6a2   :  { %1914 = vmatmul.mubr.f32.gmra.mrb[14].mxu1 %v1439_v35 }
 0x750   :  { %v1906_v8 = vpop.f32.mrb[8].mxu1 }
 0x751   :  { %v1546_v24 = vadd.f32 %v1906_v8, %v868_v47  ;;  %v1506_v27 = vpop.f32.mrb[9].mxu1 }
 0x752   :  { %v1545_v37 = vadd.f32 %v1506_v27, %v862_v46 }
 0x753   :  { %v1560_v10 = vadd.f32 %v1758_v32, %v1546_v24 }
 0x754   :  { %v1559_v44 = vadd.f32 %v1758_v32, %v1545_v37  ;;  %v1909_v12 = vpop.f32.mrb[10].mxu1 }
 0x755   :  { %v1548_v4 = vadd.f32 %v1909_v12, %v880_v16  ;;  %v1516_v48 = vpop.f32.mrb[11].mxu1  ;;  %v1568_v28 = vmax.f32 %v1560_v10, 0.0 }
 0x756   :  { %v1567_v52 = vmax.f32 %v1559_v44, 0.0  ;;  %v1547_v59 = vadd.f32 %v1516_v48, %v874_v51 }
 0x757   :  { %v1562_v40 = vadd.f32 %v1758_v32, %v1548_v4 }
 0x758   :  { %v1561_v3 = vadd.f32 %v1758_v32, %v1547_v59  ;;  %1924 = vmatprep.mubr.msk.f32.mxu0 %vm289_vm1, %v1567_v52 }
 0x759   :  { %1925 = vmatmul.mubr.msk.f32.vlgmr.msra.gmra.mrb[32].mxu0 %vm289_vm1, %v1568_v28  ;;  %v1570_v54 = vmax.f32 %v1562_v40, 0.0 }
 0x75a   :  { %v1569_v22 = vmax.f32 %v1561_v3, 0.0 }
 0x75c   :  { %1927 = vmatprep.mubr.msk.f32.mxu0 %vm289_vm1, %v1569_v22 }
 0x75d   :  { %1928 = vmatmul.mubr.msk.f32.gmra.mrb[34].mxu0 %vm289_vm1, %v1570_v54 }
 0x771   :  { %v1912_v55 = vpop.f32.mrb[12].mxu1 }
 0x772   :  { %v1550_v15 = vadd.f32 %v1912_v55, %v892_v0  ;;  %v1526_v30 = vpop.f32.mrb[13].mxu1 }
 0x773   :  { %v1549_v38 = vadd.f32 %v1526_v30, %v886_v61 }
 0x774   :  { %v1564_v53 = vadd.f32 %v1758_v32, %v1550_v15 }
 0x775   :  { %v1563_v7 = vadd.f32 %v1758_v32, %v1549_v38  ;;  %v1915_v18 = vpop.f32.mrb[14].mxu1 }
 0x776   :  { %v1552_v33 = vadd.f32 %v1915_v18, %v904_v13  ;;  %v1536_v20 = vpop.f32.mrb[15].mxu1  ;;  %v1572_v60 = vmax.f32 %v1564_v53, 0.0 }
 0x777   :  { %v1571_v23 = vmax.f32 %v1563_v7, 0.0  ;;  %v1551_v26 = vadd.f32 %v1536_v20, %v898_v1 }
 0x778   :  { %v1566_v19 = vadd.f32 %v1758_v32, %v1552_v33 }
 0x779   :  { %v1565_v9 = vadd.f32 %v1758_v32, %v1551_v26  ;;  %1930 = vmatprep.mubr.msk.f32.mxu0 %vm289_vm1, %v1571_v23 }
 0x77a   :  { %1931 = vmatmul.mubr.msk.f32.gmra.mrb[36].mxu0 %vm289_vm1, %v1572_v60  ;;  %v1574_v49 = vmax.f32 %v1566_v19, 0.0 }
 0x77b   :  { %v1573_v31 = vmax.f32 %v1565_v9, 0.0 }
 0x77d   :  { %1933 = vmatprep.mubr.msk.f32.mxu0 %vm289_vm1, %v1573_v31 }
 0x77e   :  { %1934 = vmatmul.mubr.msk.f32.gmra.mrb[38].mxu0 %vm289_vm1, %v1574_v49 }
 0x82c   :  { %v1926_v11 = vpop.f32.mrb[32].mxu0 }
 0x82d   :  { %v1682_v45 = vadd.f32 %v1926_v11, %v1759_v25  ;;  %v1676_v21 = vpop.f32.mrb[33].mxu0 }
 0x82e   :  { %v1677_v2 = vadd.f32 %v1759_v25, %v1676_v21 }
 0x82f   :  { %1716 = vst [vmem:[#allocation7 + $0x8] sm:$0xff] %v1682_v45 }
 0x830   :  { %1715 = vst [vmem:[#allocation7] sm:$0xff] %v1677_v2  ;;  %v1929_v41 = vpop.f32.mrb[34].mxu0 }
 0x831   :  { %v1692_v57 = vadd.f32 %v1929_v41, %v1759_v25  ;;  %v1686_v56 = vpop.f32.mrb[35].mxu0 }
 0x832   :  { %v1687_v58 = vadd.f32 %v1759_v25, %v1686_v56 }
 0x833   :  { %1718 = vst [vmem:[#allocation7 + $0x18] sm:$0xff] %v1692_v57 }
 0x834   :  { %1717 = vst [vmem:[#allocation7 + $0x10] sm:$0xff] %v1687_v58 }
 0x84d   :  { %v1932_v29 = vpop.f32.mrb[36].mxu0 }
 0x84e   :  { %v1702_v63 = vadd.f32 %v1932_v29, %v1759_v25  ;;  %v1696_v43 = vpop.f32.mrb[37].mxu0 }
 0x84f   :  { %v1697_v14 = vadd.f32 %v1759_v25, %v1696_v43 }
 0x850   :  { %1720 = vst [vmem:[#allocation7 + $0x28] sm:$0xff] %v1702_v63 }
 0x851   :  { %1719 = vst [vmem:[#allocation7 + $0x20] sm:$0xff] %v1697_v14  ;;  %v1935_v6 = vpop.f32.mrb[38].mxu0 }
 0x852   :  { %v1712_v42 = vadd.f32 %v1935_v6, %v1759_v25  ;;  %v1706_v5 = vpop.f32.mrb[39].mxu0 }
 0x853   :  { %v1707_v62 = vadd.f32 %v1759_v25, %v1706_v5 }
 0x854   :  { %1722 = vst [vmem:[#allocation7 + $0x38] sm:$0xff] %v1712_v42 }
 0x855   :  { %1721 = vst [vmem:[#allocation7 + $0x30] sm:$0xff] %v1707_v62 }
 0x856   :  { %2191 = shalt.err (!%p2188_p6)
}
 0x857   :  { %s2192_s29 = scalar_lea.hbm %s3064_s13, 1024 }
 0x858   :  { %p2193_p7 = scmp.ne.s32.totalorder %s3064_s13, %s2192_s29  ;;  %p2196_p8 = scmp.lt.u32.totalorder %s2192_s29, %s3064_s13 }
 0x85a   :  { %p2198_p9 = pnand %p2196_p8, %p2193_p7 }
 0x85c   :  { %2201 = shalt.err (!%p2198_p9)
}
 0x85d   :  { %s2222_s30 = smov 8  }
 0x85e   :  { %1734 = dma.vmem_to_hbm [thread:$0]  %s1729_s0, 1024, %s3064_s13, [#allocation4], %s2213_s26, %s2213_s26, %s2222_s30  }
 0x85f   :  { %2206 = dma.done.wait [#allocation4], 1024  }
 0x860   :  { %2207 = vsyncadd [#allocation4], 4294966272 }
 0x861   :  { %1738 = vsyncpa [#allocation3], 1 }
 0x862   :  { %1739 = vsyncpa [#allocation6], 1 }
 0x863   :  { %1740 = vsyncpa [#allocation4], 1 }

</bundles_post_ra>
